<compile_context>
chip_gen: v7x
topology: tpu7x:2x2x1
jax: 0.10.0
libtpu: 0.0.40
codegen_flags: <defaults>
</compile_context>

<pallas_src>
import functools

import jax
import jax.numpy as jnp
from jax.experimental import pallas as pl
from jax.experimental.pallas import tpu as pltpu


# ---------------------------------------------------------------------------
# Phase 1: per-tile feat = mlp_conv1(x); lane-wide running max -> g partials.
# Grid: (n_splits, B, T_split), t innermost.
# ---------------------------------------------------------------------------
def _phase1_kernel(x_ref, w1_ref, b1_ref, w2_ref, b2_ref, g_ref, gmax_scr,
                   *, n_true, tile_n, t_split, has_pad):
    s = pl.program_id(0)
    t = pl.program_id(2)

    x = x_ref[0]                              # (C_in, tile_n) f32
    c_in = x.shape[0]

    # Layer 1 (C_in -> 128) on the VPU: contraction depth 3 is too shallow for the MXU.
    w1 = w1_ref[...]                          # (128, C_in) f32
    h1 = b1_ref[...]                          # (128, 1) -> broadcasts up
    for c in range(c_in):                     # static unroll; C_in is tiny
        h1 = h1 + w1[:, c:c + 1] * x[c:c + 1, :]
    h1 = jnp.maximum(h1, 0.0)                 # (128, tile_n) f32

    # Layer 2 (128 -> 256) on the MXU, bf16 operands / f32 accumulation.
    feat = (jnp.dot(w2_ref[...], h1.astype(jnp.bfloat16),
                    preferred_element_type=jnp.float32) + b2_ref[...])

    @pl.when(t == 0)
    def _():
        gmax_scr[...] = jnp.full(gmax_scr.shape, -jnp.inf, gmax_scr.dtype)

    tile_global = s * t_split + t
    if has_pad:
        last_data_tile = (n_true - 1) // tile_n
        in_tail = tile_global >= last_data_tile

        @pl.when(in_tail)                      # only the tail tiles pay for the mask
        def _():
            col = jax.lax.broadcasted_iota(jnp.int32, (1, tile_n), 1)
            valid = (tile_global * tile_n + col) < n_true
            gmax_scr[...] = jnp.maximum(gmax_scr[...],
                                        jnp.where(valid, feat, -jnp.inf))

        @pl.when(jnp.logical_not(in_tail))
        def _():
            gmax_scr[...] = jnp.maximum(gmax_scr[...], feat)
    else:
        gmax_scr[...] = jnp.maximum(gmax_scr[...], feat)

    @pl.when(t == t_split - 1)                 # cross-lane reduce + narrow store once
    def _():
        g_ref[...] = jnp.max(gmax_scr[...], axis=1, keepdims=True)[None, None]


# ---------------------------------------------------------------------------
# Phase 2: recompute feat per tile from x, apply split-w3 MLP with the hoisted
# global term, lane-wide running max of the output.
# ---------------------------------------------------------------------------
def _phase2_kernel(x_ref, gterm_ref, w1_ref, b1_ref, w2_ref, b2_ref,
                   w3l_ref, w4_ref, out_ref, omax_scr,
                   *, n_true, tile_n, t_split, has_pad):
    s = pl.program_id(0)
    t = pl.program_id(2)

    x = x_ref[0]                              # (C_in, tile_n)
    c_in = x.shape[0]

    # Recompute layer 1 + layer 2 (cheap vs. the HBM round-trip they replace).
    w1 = w1_ref[...]
    h1 = b1_ref[...]
    for c in range(c_in):
        h1 = h1 + w1[:, c:c + 1] * x[c:c + 1, :]
    h1 = jnp.maximum(h1, 0.0)

    feat = (jnp.dot(w2_ref[...], h1.astype(jnp.bfloat16),
                    preferred_element_type=jnp.float32) + b2_ref[...])

    # h2 = relu(w3_local @ feat + (w3_global @ g + b3));  the ()-term is precomputed
    # in the wrapper and arrives as gterm (c_h2, 1).
    h2 = jnp.maximum(
        jnp.dot(w3l_ref[...], feat.astype(jnp.bfloat16),
                preferred_element_type=jnp.float32) + gterm_ref[0], 0.0)

    o = jnp.dot(w4_ref[...], h2.astype(jnp.bfloat16),
                preferred_element_type=jnp.float32)          # (code, tile_n); b4 in wrapper

    @pl.when(t == 0)
    def _():
        omax_scr[...] = jnp.full(omax_scr.shape, -jnp.inf, omax_scr.dtype)

    tile_global = s * t_split + t
    if has_pad:
        last_data_tile = (n_true - 1) // tile_n
        in_tail = tile_global >= last_data_tile

        @pl.when(in_tail)
        def _():
            col = jax.lax.broadcasted_iota(jnp.int32, (1, tile_n), 1)
            valid = (tile_global * tile_n + col) < n_true
            omax_scr[...] = jnp.maximum(omax_scr[...],
                                        jnp.where(valid, o, -jnp.inf))

        @pl.when(jnp.logical_not(in_tail))
        def _():
            omax_scr[...] = jnp.maximum(omax_scr[...], o)
    else:
        omax_scr[...] = jnp.maximum(omax_scr[...], o)

    @pl.when(t == t_split - 1)
    def _():
        out_ref[...] = jnp.max(omax_scr[...], axis=1, keepdims=True)[None, None]


# ---------------------------------------------------------------------------
# Wrapper
# ---------------------------------------------------------------------------
def pcn_encoder_pallas(x, params, *, tile_n=None, n_splits=None):
    """x: (B, C_in, N) float32 (PyTorch NCW layout).  Returns (B, code)."""
    w1, b1, w2, b2, w3, b3, w4, b4 = params
    B, c_in, n = x.shape
    c_feat = w2.shape[0]          # 256
    c_h2 = w3.shape[0]            # 512
    code = w4.shape[0]
    assert w3.shape[1] == 2 * c_feat

    # Split w3 so the broadcast(global) half of the concat never materializes.
    w3_local = w3[:, :c_feat]
    w3_global = w3[:, c_feat:]

    # bf16 operands for the MXU (f32 accumulation).  w1 stays f32 (VPU path).
    w2_bf = w2.astype(jnp.bfloat16)
    w3l_bf = w3_local.astype(jnp.bfloat16)
    w4_bf = w4.astype(jnp.bfloat16)

    if tile_n is None:
        tile_n = min(1024, -(-n // 128) * 128)    # lane-dense, amortizes step overhead
    assert tile_n % 128 == 0

    num_t = -(-n // tile_n)
    if n_splits is None:
        # B == 1: split the point axis so both v7x TensorCores get work.
        n_splits = 2 if (B < 2 and num_t >= 2) else 1
    n_splits = max(1, min(n_splits, num_t))
    t_split = -(-num_t // n_splits)
    n_pad = n_splits * t_split * tile_n
    has_pad = (n_pad != n)
    if has_pad:
        x = jnp.pad(x, ((0, 0), (0, 0), (0, n_pad - n)))

    # Grid-constant index maps -> weights DMA'd once, resident across all tiles.
    resident = lambda a: pl.BlockSpec(a.shape, lambda s, b, t: (0,) * a.ndim)
    x_spec = pl.BlockSpec((1, c_in, tile_n), lambda s, b, t: (b, 0, s * t_split + t))
    cparams = pltpu.CompilerParams(
        dimension_semantics=("parallel", "parallel", "arbitrary"),
        vmem_limit_bytes=32 * 1024 * 1024)
    kw = dict(n_true=n, tile_n=tile_n, t_split=t_split, has_pad=has_pad)

    # ---- Phase 1: per-split partial global max g ----
    g_part = pl.pallas_call(
        functools.partial(_phase1_kernel, **kw),
        out_shape=jax.ShapeDtypeStruct((n_splits, B, c_feat, 1), jnp.float32),
        grid_spec=pltpu.PrefetchScalarGridSpec(
            num_scalar_prefetch=0,
            grid=(n_splits, B, t_split),
            in_specs=[x_spec, resident(w1), resident(b1),
                      resident(w2_bf), resident(b2)],
            out_specs=pl.BlockSpec((1, 1, c_feat, 1), lambda s, b, t: (s, b, 0, 0)),
            scratch_shapes=[pltpu.VMEM((c_feat, tile_n), jnp.float32)]),
        compiler_params=cparams,
    )(x, w1, b1, w2_bf, b2)

    # Combine split partials; hoist the per-batch global term out of the kernel.
    g = jnp.max(g_part, axis=0)                                     # (B, 256, 1)
    gterm = jnp.einsum('oc,bci->boi', w3_global, g) + b3[None]      # (B, 512, 1)

    # ---- Phase 2: recompute feat per tile, split-w3 MLP, running max of output ----
    out_part = pl.pallas_call(
        functools.partial(_phase2_kernel, **kw),
        out_shape=jax.ShapeDtypeStruct((n_splits, B, code, 1), jnp.float32),
        grid_spec=pltpu.PrefetchScalarGridSpec(
            num_scalar_prefetch=0,
            grid=(n_splits, B, t_split),
            in_specs=[x_spec,
                      pl.BlockSpec((1, c_h2, 1), lambda s, b, t: (b, 0, 0)),
                      resident(w1), resident(b1), resident(w2_bf), resident(b2),
                      resident(w3l_bf), resident(w4_bf)],
            out_specs=pl.BlockSpec((1, 1, code, 1), lambda s, b, t: (s, b, 0, 0)),
            scratch_shapes=[pltpu.VMEM((code, tile_n), jnp.float32)]),
        compiler_params=cparams,
    )(x, gterm, w1, b1, w2_bf, b2, w3l_bf, w4_bf)

    # b4 added once, after the max (exact); combine split partials.
    return jnp.max(out_part, axis=0)[:, :, 0] + b4[:, 0][None]      # (B, code)


# ---------------------------------------------------------------------------
# Synthetic parameters (PyTorch Conv1d(k=1) convention: weight (C_out, C_in),
# bias stored as a (C_out, 1) column) and a pure-JAX f32 reference.
# ---------------------------------------------------------------------------
def make_params(key, inputs, code_nfts):
    def init(k, cin, cout):
        kw_, kb = jax.random.split(k)
        bound = 1.0 / (cin ** 0.5)
        w = jax.random.uniform(kw_, (cout, cin), jnp.float32, -bound, bound)
        b = jax.random.uniform(kb, (cout, 1), jnp.float32, -bound, bound)
        return w, b

    k1, k2, k3, k4 = jax.random.split(key, 4)
    w1, b1 = init(k1, inputs, 128)        # mlp_conv1 hidden
    w2, b2 = init(k2, 128, 256)           # mlp_conv1 out -> feat
    w3, b3 = init(k3, 512, 512)           # mlp_conv2 hidden (input = [feat; global])
    w4, b4 = init(k4, 512, code_nfts)     # mlp_conv2 out
    return (w1, b1, w2, b2, w3, b3, w4, b4)


def pcn_encoder_ref(x, params):
    """Pure-JAX f32 reference with the exact PyTorch forward structure (incl. concat)."""
    w1, b1, w2, b2, w3, b3, w4, b4 = params
    hi = jax.lax.Precision.HIGHEST
    h1 = jnp.maximum(jnp.einsum('oc,bcn->bon', w1, x, precision=hi) + b1[None], 0.0)
    f = jnp.einsum('oc,bcn->bon', w2, h1, precision=hi) + b2[None]          # (B, 256, N)
    g = jnp.max(f, axis=2, keepdims=True)                                    # (B, 256, 1)
    cat = jnp.concatenate([f, jnp.broadcast_to(g, f.shape)], axis=1)         # (B, 512, N)
    h2 = jnp.maximum(jnp.einsum('oc,bcn->bon', w3, cat, precision=hi) + b3[None], 0.0)
    o = jnp.einsum('oc,bcn->bon', w4, h2, precision=hi) + b4[None]           # (B, code, N)
    return jnp.max(o, axis=2)                                                # (B, code)


if __name__ == "__main__":
    key = jax.random.PRNGKey(0)
    kx, kp = jax.random.split(key)

    C_in, code_nfts, N = 3, 256, 300      # N not a multiple of the tile -> tail masking
    params = make_params(kp, C_in, code_nfts)

    # bf16 matmul operands vs f32/HIGHEST reference -> loosened tolerance.
    TOL = 2e-2

    # Case 1: B=2, multi-tile, partial tail mask (n_splits=1).
    x2 = jax.random.normal(kx, (2, C_in, N), dtype=jnp.float32)
    out2 = jax.block_until_ready(pcn_encoder_pallas(x2, params, tile_n=128))
    ref2 = jax.block_until_ready(pcn_encoder_ref(x2, params))
    assert out2.shape == (2, code_nfts)
    assert jnp.allclose(out2, ref2, atol=TOL, rtol=TOL), "mismatch vs reference (B=2)"

    # Case 2: B=1 -> automatic 2-way N-split (v7x dual-TC path), incl. a fully
    # padded tile in the second split; partial maxes combined in the wrapper.
    x1 = x2[:1]
    out1 = jax.block_until_ready(pcn_encoder_pallas(x1, params, tile_n=128))
    ref1 = jax.block_until_ready(pcn_encoder_ref(x1, params))
    assert out1.shape == (1, code_nfts)
    assert jnp.allclose(out1, ref1, atol=TOL, rtol=TOL), "mismatch vs reference (B=1)"

    print("KERNEL_OK")
</pallas_src>

<mosaic_0001>
module attributes {stable_mosaic.version = 11 : i64} {
  func.func @_phase1_kernel(%arg0: i32, %arg1: i32, %arg2: i32, %arg3: memref<1x3x128xf32, #tpu.memory_space<vmem>>, %arg4: memref<128x3xf32, #tpu.memory_space<vmem>>, %arg5: memref<128x1xf32, #tpu.memory_space<vmem>>, %arg6: memref<256x128xbf16, #tpu.memory_space<vmem>>, %arg7: memref<256x1xf32, #tpu.memory_space<vmem>>, %arg8: memref<1x1x256x1xf32, #tpu.memory_space<vmem>>, %arg9: memref<256x128xf32, #tpu.memory_space<vmem>>) attributes {dimension_semantics = [#tpu.dimension_semantics<parallel>, #tpu.dimension_semantics<parallel>, #tpu.dimension_semantics<arbitrary>], iteration_bounds = array<i64: 1, 2, 3>, scalar_prefetch = 0 : i64, scratch_operands = 1 : i64, tpu.core_type = #tpu.core_type<tc>, window_params = [{transform_indices = @transform_0, window_bounds = array<i64: 1, 3, 128>}, {pipeline_mode = #tpu.pipeline_mode<synchronous>, transform_indices = @transform_1, window_bounds = array<i64: 128, 3>}, {pipeline_mode = #tpu.pipeline_mode<synchronous>, transform_indices = @transform_2, window_bounds = array<i64: 128, 1>}, {pipeline_mode = #tpu.pipeline_mode<synchronous>, transform_indices = @transform_3, window_bounds = array<i64: 256, 128>}, {pipeline_mode = #tpu.pipeline_mode<synchronous>, transform_indices = @transform_4, window_bounds = array<i64: 256, 1>}, {transform_indices = @transform_5, window_bounds = array<i64: 1, 1, 256, 1>}]} {
    %c0 = arith.constant 0 : index
    %c0_0 = arith.constant 0 : index
    %c0_1 = arith.constant 0 : index
    %0 = vector.load %arg3[%c0, %c0_0, %c0_1] : memref<1x3x128xf32, #tpu.memory_space<vmem>>, vector<1x3x128xf32>
    %1 = vector.shape_cast %0 : vector<1x3x128xf32> to vector<3x128xf32>
    %c0_2 = arith.constant 0 : index
    %c0_3 = arith.constant 0 : index
    %2 = vector.load %arg4[%c0_2, %c0_3] : memref<128x3xf32, #tpu.memory_space<vmem>>, vector<128x3xf32>
    %c0_4 = arith.constant 0 : index
    %c0_5 = arith.constant 0 : index
    %3 = vector.load %arg5[%c0_4, %c0_5] : memref<128x1xf32, #tpu.memory_space<vmem>>, vector<128x1xf32>
    %4 = vector.extract_strided_slice %2 {offsets = [0, 0], sizes = [128, 1], strides = [1, 1]} : vector<128x3xf32> to vector<128x1xf32>
    %5 = vector.extract_strided_slice %1 {offsets = [0, 0], sizes = [1, 128], strides = [1, 1]} : vector<3x128xf32> to vector<1x128xf32>
    %6 = vector.broadcast %4 : vector<128x1xf32> to vector<128x128xf32>
    %7 = vector.broadcast %5 : vector<1x128xf32> to vector<128x128xf32>
    %8 = arith.mulf %6, %7 : vector<128x128xf32>
    %9 = vector.broadcast %3 : vector<128x1xf32> to vector<128x128xf32>
    %10 = arith.addf %9, %8 : vector<128x128xf32>
    %11 = vector.extract_strided_slice %2 {offsets = [0, 1], sizes = [128, 1], strides = [1, 1]} : vector<128x3xf32> to vector<128x1xf32>
    %12 = vector.extract_strided_slice %1 {offsets = [1, 0], sizes = [1, 128], strides = [1, 1]} : vector<3x128xf32> to vector<1x128xf32>
    %13 = vector.broadcast %11 : vector<128x1xf32> to vector<128x128xf32>
    %14 = vector.broadcast %12 : vector<1x128xf32> to vector<128x128xf32>
    %15 = arith.mulf %13, %14 : vector<128x128xf32>
    %16 = arith.addf %10, %15 : vector<128x128xf32>
    %17 = vector.extract_strided_slice %2 {offsets = [0, 2], sizes = [128, 1], strides = [1, 1]} : vector<128x3xf32> to vector<128x1xf32>
    %18 = vector.extract_strided_slice %1 {offsets = [2, 0], sizes = [1, 128], strides = [1, 1]} : vector<3x128xf32> to vector<1x128xf32>
    %19 = vector.broadcast %17 : vector<128x1xf32> to vector<128x128xf32>
    %20 = vector.broadcast %18 : vector<1x128xf32> to vector<128x128xf32>
    %21 = arith.mulf %19, %20 : vector<128x128xf32>
    %22 = arith.addf %16, %21 : vector<128x128xf32>
    %cst = arith.constant 0.000000e+00 : f32
    %23 = vector.broadcast %cst : f32 to vector<128x128xf32>
    %24 = arith.maximumf %22, %23 : vector<128x128xf32>
    %c0_6 = arith.constant 0 : index
    %c0_7 = arith.constant 0 : index
    %25 = vector.load %arg6[%c0_6, %c0_7] : memref<256x128xbf16, #tpu.memory_space<vmem>>, vector<256x128xbf16>
    %26 = arith.truncf %24 : vector<128x128xf32> to vector<128x128xbf16>
    %cst_8 = arith.constant dense<0.000000e+00> : vector<256x128xf32>
    %27 = tpu.matmul %25, %26, %cst_8 {dimension_numbers = #tpu.dot_dimension_numbers<[1], [0], [0], [1], [0, 0, 1, 1], [], []>} : vector<256x128xbf16>, vector<128x128xbf16>, vector<256x128xf32> -> vector<256x128xf32>
    %c0_9 = arith.constant 0 : index
    %c0_10 = arith.constant 0 : index
    %28 = vector.load %arg7[%c0_9, %c0_10] : memref<256x1xf32, #tpu.memory_space<vmem>>, vector<256x1xf32>
    %29 = vector.broadcast %28 : vector<256x1xf32> to vector<256x128xf32>
    %30 = arith.addf %27, %29 : vector<256x128xf32>
    %c0_i32 = arith.constant 0 : i32
    %31 = arith.cmpi eq, %arg2, %c0_i32 : i32
    %32 = arith.extui %31 : i1 to i32
    %c0_i32_11 = arith.constant 0 : i32
    %33 = arith.cmpi ne, %32, %c0_i32_11 : i32
    scf.if %33 {
      %cst_16 = arith.constant 0xFF800000 : f32
      %45 = vector.broadcast %cst_16 : f32 to vector<256x128xf32>
      %c0_17 = arith.constant 0 : index
      %c0_18 = arith.constant 0 : index
      %46 = vector.load %arg9[%c0_17, %c0_18] : memref<256x128xf32, #tpu.memory_space<vmem>>, vector<256x128xf32>
      tpu.vector_store %arg9[%c0_17, %c0_18], %45 {strides = array<i32>} : memref<256x128xf32, #tpu.memory_space<vmem>>, vector<256x128xf32>,
    } else {
    }
    %c3_i32 = arith.constant 3 : i32
    %34 = arith.muli %arg0, %c3_i32 : i32
    %35 = arith.addi %34, %arg2 : i32
    %c2_i32 = arith.constant 2 : i32
    %36 = arith.cmpi sge, %35, %c2_i32 : i32
    %37 = arith.extui %36 : i1 to i32
    %c0_i32_12 = arith.constant 0 : i32
    %38 = arith.cmpi ne, %37, %c0_i32_12 : i32
    scf.if %38 {
      %45 = tpu.iota {dimensions = array<i32: 1>} : vector<1x128xi32>
      %c128_i32 = arith.constant 128 : i32
      %46 = arith.muli %35, %c128_i32 : i32
      %47 = vector.broadcast %46 : i32 to vector<1x128xi32>
      %48 = arith.addi %47, %45 : vector<1x128xi32>
      %c300_i32 = arith.constant 300 : i32
      %49 = vector.broadcast %c300_i32 : i32 to vector<1x128xi32>
      %50 = arith.cmpi slt, %48, %49 : vector<1x128xi32>
      %c0_16 = arith.constant 0 : index
      %c0_17 = arith.constant 0 : index
      %51 = vector.load %arg9[%c0_16, %c0_17] : memref<256x128xf32, #tpu.memory_space<vmem>>, vector<256x128xf32>
      %cst_18 = arith.constant 0xFF800000 : f32
      %52 = vector.shape_cast %50 : vector<1x128xi1> to vector<1x128xi1>
      %53 = vector.broadcast %52 : vector<1x128xi1> to vector<256x128xi1>
      %54 = vector.broadcast %cst_18 : f32 to vector<256x128xf32>
      %55 = arith.select %53, %30, %54 : vector<256x128xi1>, vector<256x128xf32>
      %56 = arith.maximumf %51, %55 : vector<256x128xf32>
      %c0_19 = arith.constant 0 : index
      %c0_20 = arith.constant 0 : index
      %57 = vector.load %arg9[%c0_19, %c0_20] : memref<256x128xf32, #tpu.memory_space<vmem>>, vector<256x128xf32>
      tpu.vector_store %arg9[%c0_19, %c0_20], %56 {strides = array<i32>} : memref<256x128xf32, #tpu.memory_space<vmem>>, vector<256x128xf32>,
    } else {
    }
    %true = arith.constant true
    %39 = arith.xori %36, %true : i1
    %40 = arith.extui %39 : i1 to i32
    %c0_i32_13 = arith.constant 0 : i32
    %41 = arith.cmpi ne, %40, %c0_i32_13 : i32
    scf.if %41 {
      %c0_16 = arith.constant 0 : index
      %c0_17 = arith.constant 0 : index
      %45 = vector.load %arg9[%c0_16, %c0_17] : memref<256x128xf32, #tpu.memory_space<vmem>>, vector<256x128xf32>
      %46 = arith.maximumf %45, %30 : vector<256x128xf32>
      %c0_18 = arith.constant 0 : index
      %c0_19 = arith.constant 0 : index
      %47 = vector.load %arg9[%c0_18, %c0_19] : memref<256x128xf32, #tpu.memory_space<vmem>>, vector<256x128xf32>
      tpu.vector_store %arg9[%c0_18, %c0_19], %46 {strides = array<i32>} : memref<256x128xf32, #tpu.memory_space<vmem>>, vector<256x128xf32>,
    } else {
    }
    %c2_i32_14 = arith.constant 2 : i32
    %42 = arith.cmpi eq, %arg2, %c2_i32_14 : i32
    %43 = arith.extui %42 : i1 to i32
    %c0_i32_15 = arith.constant 0 : i32
    %44 = arith.cmpi ne, %43, %c0_i32_15 : i32
    scf.if %44 {
      %c0_16 = arith.constant 0 : index
      %c0_17 = arith.constant 0 : index
      %45 = vector.load %arg9[%c0_16, %c0_17] : memref<256x128xf32, #tpu.memory_space<vmem>>, vector<256x128xf32>
      %cst_18 = arith.constant dense<0xFF800000> : vector<256xf32>
      %46 = vector.multi_reduction <maximumf>, %45, %cst_18 [1] : vector<256x128xf32> to vector<256xf32>
      %47 = vector.shape_cast %46 : vector<256xf32> to vector<256x1xf32>
      %48 = vector.shape_cast %47 : vector<256x1xf32> to vector<1x1x256x1xf32>
      %c0_19 = arith.constant 0 : index
      %c0_20 = arith.constant 0 : index
      %c0_21 = arith.constant 0 : index
      %c0_22 = arith.constant 0 : index
      %49 = vector.load %arg8[%c0_19, %c0_20, %c0_21, %c0_22] : memref<1x1x256x1xf32, #tpu.memory_space<vmem>>, vector<1x1x256x1xf32>
      tpu.vector_store %arg8[%c0_19, %c0_20, %c0_21, %c0_22], %48 {strides = array<i32>} : memref<1x1x256x1xf32, #tpu.memory_space<vmem>>, vector<1x1x256x1xf32>,
    } else {
    }
    return
  }
  func.func @transform_0(%arg0: i32, %arg1: i32, %arg2: i32) -> (i32, i32, i32) {
    %c3_i32 = arith.constant 3 : i32
    %0 = arith.muli %arg0, %c3_i32 : i32
    %1 = arith.addi %0, %arg2 : i32
    %c0_i32 = arith.constant 0 : i32
    %c0_i32_0 = arith.constant 0 : i32
    return %arg1, %c0_i32, %1 : i32, i32, i32
  }
  func.func @transform_1(%arg0: i32, %arg1: i32, %arg2: i32) -> (i32, i32) {
    %c0_i32 = arith.constant 0 : i32
    %c0_i32_0 = arith.constant 0 : i32
    %c0_i32_1 = arith.constant 0 : i32
    return %c0_i32, %c0_i32_0 : i32, i32
  }
  func.func @transform_2(%arg0: i32, %arg1: i32, %arg2: i32) -> (i32, i32) {
    %c0_i32 = arith.constant 0 : i32
    %c0_i32_0 = arith.constant 0 : i32
    %c0_i32_1 = arith.constant 0 : i32
    return %c0_i32, %c0_i32_0 : i32, i32
  }
  func.func @transform_3(%arg0: i32, %arg1: i32, %arg2: i32) -> (i32, i32) {
    %c0_i32 = arith.constant 0 : i32
    %c0_i32_0 = arith.constant 0 : i32
    %c0_i32_1 = arith.constant 0 : i32
    return %c0_i32, %c0_i32_0 : i32, i32
  }
  func.func @transform_4(%arg0: i32, %arg1: i32, %arg2: i32) -> (i32, i32) {
    %c0_i32 = arith.constant 0 : i32
    %c0_i32_0 = arith.constant 0 : i32
    %c0_i32_1 = arith.constant 0 : i32
    return %c0_i32, %c0_i32_0 : i32, i32
  }
  func.func @transform_5(%arg0: i32, %arg1: i32, %arg2: i32) -> (i32, i32, i32, i32) {
    %c0_i32 = arith.constant 0 : i32
    %c0_i32_0 = arith.constant 0 : i32
    %c0_i32_1 = arith.constant 0 : i32
    return %arg0, %arg1, %c0_i32, %c0_i32_0 : i32, i32, i32, i32
  }
}

</mosaic_0001>

<bundles_post_ra>
// kernel: tpu_custom_call.1
= control target key start
LH: loop header
LB: loop body
LE: loop exit
PB: predicated region body
PF: predicated region fallthrough
CT: control target
= control target key end

     0   :  { %s2008_s18 = smov 0   ;;  %s2010_s19 = smov 0   ;;  %s2786_s0 = inlined_call_operand.vmem [shape: f32[2,3,384], index: 0, kind: input, shape index: {}]   ;;  %s2787_s1 = inlined_call_operand.vmem [shape: f32[128,3], index: 1, kind: input, shape index: {}]   ;;  %s2788_s2 = inlined_call_operand.vmem [shape: f32[128,1], index: 2, kind: input, shape index: {}]   ;;  %s2789_s3 = inlined_call_operand.vmem [shape: bf16[256,128], index: 3, kind: input, shape index: {}]   ;;  %s2790_s4 = inlined_call_operand.vmem [shape: f32[256,1], index: 4, kind: input, shape index: {}]   ;;  %s2791_s5 = inlined_call_operand.vmem [shape: f32[1,2,256,1], index: 5, kind: output, shape index: {}]  }
   0x1   :  { %s2012_s20 = smov 0   ;;  %s2014_s21 = smov 0  }
   0x2   :  { %s2016_s22 = smov 0  }
   0x3 LB: > { %s27_s23 = sadd.s32 1, %s1964_s20  ;;  %s30_s24 = sadd.s32 1, %s1968_s21  ;;  %s1972_s22 = sphi %s2016_s22, %s15_s22   ;;  %s1968_s21 = sphi %s2014_s21, %s2795_s21   ;;  %s1964_s20 = sphi %s2012_s20, %s2794_s20   ;;  %s1960_s19 = sphi %s2010_s19, %s2793_s19   ;;  %s1956_s18 = sphi %s2008_s18, %s2792_s18  }
   0x4   : > { %p28_p0 = scmp.ge.s32.totalorder %s27_s23, 3  ;;  %p1724_p1 = scmp.ge.s32.totalorder %s1972_s22, 1 }
   0x5   : > { %p221_p2 = scmp.lt.s32.totalorder %s1972_s22, 7 }
   0x6   : > { %s2797_s23 = smov (%p28_p0, %s27_s23), 0  ;;  %s2799_s24 = smov (!%p28_p0, %s30_s24), %s1968_s21 }
   0x7   : > { %p222_p3 = pnand %p1724_p1, %p221_p2  ;;  %p32_p4 = scmp.ge.s32.totalorder %s2799_s24, 2 }
   0x8   : > { %v2043_v0 = vld [vmem:[%s2787_s1 + $0x10] sm:$0xff] (!%p222_p3)  ;;  %v282_v1 = vld [vmem:[%s2787_s1 + $0x8] sm:$0xff] (!%p222_p3)  ;;  %v1974_v2 = vmov (!%p222_p3), 2   ;;  %v1975_v3 = vmov (!%p222_p3), 0   ;;  %p260_p5 = scmp.lt.s32.totalorder (!%p222_p3), %s1960_s19, 1  ;;  %v284_v4 = vld [vmem:[%s2787_s1 + $0x18] sm:$0xff] (!%p222_p3)  ;;  %v393_v56 = vlaneseq (!%p222_p3) }
   0x9   : > { %s2801_s24 = smov (%p32_p4, %s2799_s24), 0  ;;  %225 = sbr.rel (%p222_p3) target bundleno = 834 (0x342), region = 40 }
   0xa   : > { %1888 = vset.pattern.permute.xlu0 (!%p222_p3), %v1974_v2  ;;  %1885 = vset.pattern.permute.xlu1 (!%p222_p3), %v1975_v3  ;;  %v286_v5 = vld [vmem:[%s2787_s1 + $0x28] sm:$0xff] (!%p222_p3)  ;;  %v2068_v6 = vld [vmem:[%s2787_s1 + $0x38] sm:$0xff] (!%p222_p3)  ;;  %v281_v8 = vld [vmem:[%s2787_s1] sm:$0xff] (!%p222_p3)  ;;  %v1976_v11 = vmov (!%p222_p3), 1   ;;  %p262_p6 = scmp.lt.s32.totalorder (!%p222_p3), %s1956_s18, 2  ;;  %v394_v59 = vshrl.u32 (!%p222_p3), %v393_v56, 7 }
   0xb   : > { %325 = vperm.xlu1 (!%p222_p3), %1885, %v2043_v0   ;;  %614 = vperm.xlu0 (!%p222_p3), %1888, %v282_v1   ;;  %v2073_v7 = vld [vmem:[%s2787_s1 + $0x48] sm:$0xff] (!%p222_p3)  ;;  %v285_v10 = vld [vmem:[%s2787_s1 + $0x20] sm:$0xff] (!%p222_p3)  ;;  %v287_v12 = vld [vmem:[%s2787_s1 + $0x30] sm:$0xff] (!%p222_p3)  ;;  %p1744_p7 = scmp.ne.s32.totalorder (!%p222_p3), %s1956_s18, 0 }
   0xc   : > { %v298_v9 = vld [vmem:[%s2788_s2 + $0x8] sm:$0xff] (!%p222_p3)  ;;  %v2096_v13 = vld [vmem:[%s2787_s1 + $0x40] sm:$0xff] (!%p222_p3)  ;;  %v299_v14 = vld [vmem:[%s2788_s2 + $0x10] sm:$0xff] (!%p222_p3)  ;;  %v395_v62 = vsub.s32 (!%p222_p3), 0, %v394_v59  ;;  %v575_v63 = vsub.s32 (!%p222_p3), 1, %v394_v59 }
   0xd   : > { %v297_v15 = vld [vmem:[%s2788_s2] sm:$0xff] (!%p222_p3)  ;;  %v300_v16 = vld [vmem:[%s2788_s2 + $0x18] sm:$0xff] (!%p222_p3)  ;;  %v307_v18 = vld [vmem:[%s2788_s2 + $0x50] sm:$0xff] (!%p222_p3) }
   0xe   : > { %v2112_v17 = vld [vmem:[%s2787_s1 + $0x58] sm:$0xff] (!%p222_p3)  ;;  %v2122_v19 = vld [vmem:[%s2787_s1 + $0x68] sm:$0xff] (!%p222_p3)  ;;  %v309_v20 = vld [vmem:[%s2788_s2 + $0x60] sm:$0xff] (!%p222_p3) }
   0xf   : > { %330 = vperm.xlu1 (!%p222_p3), %1885, %v284_v4   ;;  %622 = vperm.xlu0 (!%p222_p3), %1888, %v284_v4   ;;  %v301_v21 = vld [vmem:[%s2788_s2 + $0x20] sm:$0xff] (!%p222_p3)  ;;  %v2137_v22 = vld [vmem:[%s2787_s1 + $0x78] sm:$0xff] (!%p222_p3)  ;;  %v302_v23 = vld [vmem:[%s2788_s2 + $0x28] sm:$0xff] (!%p222_p3) }
  0x10   : > { %s2803_s19 = smov (!%p260_p5, %s1960_s19), 1  ;;  %v311_v24 = vld [vmem:[%s2788_s2 + $0x70] sm:$0xff]  ;;  %v304_v26 = vld [vmem:[%s2788_s2 + $0x38] sm:$0xff]  ;;  %v305_v28 = vld [vmem:[%s2788_s2 + $0x40] sm:$0xff] }
  0x11   : > { %s1751_s6 = sshll.u32 %s2803_s19, 8  ;;  %v303_v25 = vld [vmem:[%s2788_s2 + $0x30] sm:$0xff]  ;;  %v293_v29 = vld [vmem:[%s2787_s1 + $0x60] sm:$0xff]  ;;  %v306_v31 = vld [vmem:[%s2788_s2 + $0x48] sm:$0xff]  ;;  %s1840_s25 = smul.u32 3, %s2803_s19 }
  0x12   : > { %s2060_s9 = scalar_lea.vmem %s2791_s5, %s1751_s6  ;;  %v291_v27 = vld [vmem:[%s2787_s1 + $0x50] sm:$0xff]  ;;  %v308_v32 = vld [vmem:[%s2788_s2 + $0x58] sm:$0xff]  ;;  %v310_v41 = vld [vmem:[%s2788_s2 + $0x68] sm:$0xff] }
  0x13   : > { %340 = vperm.xlu1 %1885, %v286_v5   ;;  %630 = vperm.xlu0 %1888, %v286_v5   ;;  %v2174_v30 = vld [vmem:[%s2787_s1 + $0x70] sm:$0xff]  ;;  %v312_v53 = vld [vmem:[%s2788_s2 + $0x78] sm:$0xff]  ;;  %s263_s17 = scalar_select %p262_p6, %s1956_s18, 2 }
  0x15   : > { %s265_s26 = sadd.s32 %s1840_s25, %s263_s17 }
  0x16   : > { %s1725_s27 = sshll.u32 %s265_s26, 2 }
  0x17   : > { %350 = vperm.xlu1 %1885, %v2068_v6   ;;  %638 = vperm.xlu0 %1888, %v2068_v6   ;;  %s267_s29 = scalar_lea.vmem %s2786_s0, %s1725_s27 }
  0x1b   : > { %360 = vperm.xlu1 %1885, %v2073_v7   ;;  %1898 = vset.pattern.permute.xlu0 %v1975_v3 }
  0x1c   : > { %315 = vperm.xlu0 %1898, %v281_v8  }
  0x1f   : > { %420 = vperm.xlu1 %1885, %v298_v9   ;;  %v766_v9 = vld [vmem:[%s2790_s4 + $0x8] sm:$0xff] }
  0x20   : > { %320 = vperm.xlu0 %1898, %v282_v1  }
  0x23   : > { %1886 = vset.pattern.permute.xlu1 %v1976_v11 }
  0x24   : > { %514 = vperm.xlu1 %1886, %v282_v1   ;;  %335 = vperm.xlu0 %1898, %v285_v10  }
  0x28   : > { %1887 = vset.pattern.permute.xlu1 %v1974_v2  ;;  %345 = vperm.xlu0 %1898, %v287_v12  }
  0x29   : > { %610 = vperm.xlu1 %1887, %v281_v8  }
  0x2c   : > { %355 = vperm.xlu0 %1898, %v2096_v13  }
  0x2d   : > { %1889 = vset.pattern.permute.xlu1 %v1975_v3 }
  0x2e   : > { %425 = vperm.xlu1 %1889, %v299_v14   ;;  %v1919_v14 = vld [vmem:[%s2789_s3 + $0x40] sm:$0xff]  }
  0x2f   : > { %1808 = vmatprep.mubr.bf16.mxu1 %v1919_v14 }
  0x30   : > { %415 = vperm.xlu0 %1898, %v297_v15   ;;  %v767_v15 = vld [vmem:[%s2790_s4 + $0x10] sm:$0xff] }
  0x32   : > { %430 = vperm.xlu1 %1889, %v300_v16  }
  0x34   : > { %370 = vperm.xlu0 %1898, %v2112_v17  }
  0x36   : > { %1890 = vset.pattern.permute.xlu1 %v1976_v11 }
  0x37   : > { %522 = vperm.xlu1 %1890, %v284_v4   ;;  %v765_v4 = vld [vmem:[%s2790_s4] sm:$0xff] }
  0x38   : > { %465 = vperm.xlu0 %1898, %v307_v18   ;;  %v768_v18 = vld [vmem:[%s2790_s4 + $0x18] sm:$0xff] }
  0x3b   : > { %1891 = vset.pattern.permute.xlu1 %v1974_v2 }
  0x3c   : > { %380 = vperm.xlu0 %1898, %v2122_v19   ;;  %618 = vperm.xlu1 %1891, %v2043_v0  }
  0x40   : > { %475 = vperm.xlu0 %1898, %v309_v20   ;;  %1892 = vset.pattern.permute.xlu1 %v1975_v3 }
  0x41   : > { %435 = vperm.xlu1 %1892, %v301_v21   ;;  %v770_v21 = vld [vmem:[%s2790_s4 + $0x28] sm:$0xff] }
  0x44   : > { %390 = vperm.xlu0 %1898, %v2137_v22  }
  0x45   : > { %440 = vperm.xlu1 %1892, %v302_v23  }
  0x48   : > { %485 = vperm.xlu0 %1898, %v311_v24  }
  0x49   : > { %1893 = vset.pattern.permute.xlu1 %v1976_v11 }
  0x4a   : > { %530 = vperm.xlu1 %1893, %v286_v5  }
  0x4c   : > { %1911 = vset.pattern.permute.xlu0 %v1976_v11 }
  0x4d   : > { %510 = vperm.xlu0 %1911, %v281_v8  }
  0x4e   : > { %1894 = vset.pattern.permute.xlu1 %v1974_v2 }
  0x4f   : > { %626 = vperm.xlu1 %1894, %v285_v10  }
  0x51   : > { %518 = vperm.xlu0 %1911, %v2043_v0   ;;  %v280_v0 = vld [vmem:[%s267_s29] sm:$0x7] }
  0x52   : > { %v2271_v8 = vrot.slane %v280_v0, %v575_v63 }
  0x53   : > { %1895 = vset.pattern.permute.xlu1 %v1975_v3 }
  0x54   : > { %445 = vperm.xlu1 %1895, %v303_v25  }
  0x55   : > { %526 = vperm.xlu0 %1911, %v285_v10  }
  0x58   : > { %450 = vperm.xlu1 %1895, %v304_v26  }
  0x59   : > { %534 = vperm.xlu0 %1911, %v287_v12  }
  0x5c   : > { %1896 = vset.pattern.permute.xlu1 %v1976_v11 }
  0x5d   : > { %538 = vperm.xlu1 %1896, %v2068_v6   ;;  %542 = vperm.xlu0 %1911, %v2096_v13   ;;  %v2269_v6 = vrot.slane %v280_v0, %v395_v62 }
  0x61   : > { %1897 = vset.pattern.permute.xlu1 %v1974_v2  ;;  %550 = vperm.xlu0 %1911, %v291_v27  }
  0x62   : > { %634 = vperm.xlu1 %1897, %v287_v12  }
  0x65   : > { %558 = vperm.xlu0 %1911, %v293_v29  }
  0x66   : > { %1899 = vset.pattern.permute.xlu1 %v1975_v3 }
  0x67   : > { %455 = vperm.xlu1 %1899, %v305_v28  }
  0x69   : > { %566 = vperm.xlu0 %1911, %v2174_v30  }
  0x6b   : > { %460 = vperm.xlu1 %1899, %v306_v31  }
  0x6d   : > { %1915 = vset.pattern.permute.xlu0 %v1974_v2 }
  0x6e   : > { %670 = vperm.xlu0 %1915, %v2137_v22  }
  0x6f   : > { %1900 = vset.pattern.permute.xlu1 %v1976_v11 }
  0x70   : > { %546 = vperm.xlu1 %1900, %v2073_v7  }
  0x72   : > { %1917 = vset.pattern.permute.xlu0 %v1975_v3 }
  0x73   : > { %809 = vperm.xlu0 %1917, %v767_v15  }
  0x74   : > { %1901 = vset.pattern.permute.xlu1 %v1975_v3 }
  0x75   : > { %365 = vperm.xlu1 %1901, %v291_v27  }
  0x77   : > { %824 = vperm.xlu0 %1917, %v770_v21  }
  0x79   : > { %1902 = vset.pattern.permute.xlu1 %v1974_v2 }
  0x7a   : > { %642 = vperm.xlu1 %1902, %v2096_v13  }
  0x7e   : > { %646 = vperm.xlu1 %1902, %v2073_v7   ;;  %v675_v7 = vsub.s32 2, %v394_v59 }
  0x80   : > { %v2279_v12 = vrot.slane %v280_v0, %v675_v7 }
  0x82   : > { %1903 = vset.pattern.permute.xlu1 %v1975_v3 }
  0x83   : > { %470 = vperm.xlu1 %1903, %v308_v32  }
  0x87   : > { %1904 = vset.pattern.permute.xlu1 %v1976_v11 }
  0x88   : > { %554 = vperm.xlu1 %1904, %v2112_v17  }
  0x8a   : > { %v2195_v33 = vpop.permute.xlu1 %325  ;;  %v2197_v34 = vpop.permute.xlu0 %614 }
  0x8b   : > { %v399_v32 = vmul.f32 %v2269_v6, %v2195_v33  ;;  %v771_v33 = vld [vmem:[%s2790_s4 + $0x30] sm:$0xff] }
  0x8c   : > { %1905 = vset.pattern.permute.xlu1 %v1975_v3 }
  0x8d   : > { %375 = vperm.xlu1 %1905, %v293_v29  }
  0x8e   : > { %v2200_v35 = vpop.permute.xlu1 %330  ;;  %v2202_v36 = vpop.permute.xlu0 %622 }
  0x8f   : > { %v400_v23 = vmul.f32 %v2269_v6, %v2200_v35 }
  0x91   : > { %1906 = vset.pattern.permute.xlu1 %v1974_v2 }
  0x92   : > { %v2205_v37 = vpop.permute.xlu1 %340  ;;  %650 = vperm.xlu1 %1906, %v291_v27   ;;  %v2207_v38 = vpop.permute.xlu0 %630  ;;  %v769_v27 = vld [vmem:[%s2790_s4 + $0x20] sm:$0xff] }
  0x93   : > { %v682_v62 = vmul.f32 %v2279_v12, %v2207_v38 }
  0x96   : > { %v2209_v39 = vpop.permute.xlu1 %350  ;;  %654 = vperm.xlu1 %1906, %v2112_v17   ;;  %v2212_v40 = vpop.permute.xlu0 %638 }
  0x9a   : > { %v2217_v42 = vpop.permute.xlu1 %360  ;;  %1907 = vset.pattern.permute.xlu1 %v1975_v3 }
  0x9b   : > { %v316_v43 = vpop.permute.xlu0 %315  ;;  %480 = vperm.xlu1 %1907, %v310_v41  }
  0x9c   : > { %v397_v16 = vmul.f32 %v2269_v6, %v316_v43 }
  0x9e   : > { %v421_v44 = vpop.permute.xlu1 %420 }
  0x9f   : > { %v321_v45 = vpop.permute.xlu0 %320  ;;  %1908 = vset.pattern.permute.xlu1 %v1976_v11 }
  0xa0   : > { %562 = vperm.xlu1 %1908, %v2122_v19   ;;  %v398_v10 = vmul.f32 %v2269_v6, %v321_v45 }
  0xa3   : > { %v515_v46 = vpop.permute.xlu1 %514  ;;  %v2222_v47 = vpop.permute.xlu0 %335 }
  0xa4   : > { %1909 = vset.pattern.permute.xlu1 %v1975_v3  ;;  %v578_v13 = vmul.f32 %v2271_v8, %v515_v46 }
  0xa5   : > { %385 = vperm.xlu1 %1909, %v2174_v30  }
  0xa7   : > { %v2226_v48 = vpop.permute.xlu0 %345 }
  0xa8   : > { %v2228_v49 = vpop.permute.xlu1 %610 }
  0xa9   : > { %1910 = vset.pattern.permute.xlu1 %v1974_v2  ;;  %v677_v45 = vmul.f32 %v2279_v12, %v2228_v49  ;;  %v774_v49 = vld [vmem:[%s2790_s4 + $0x48] sm:$0xff] }
  0xaa   : > { %658 = vperm.xlu1 %1910, %v293_v29  }
  0xab   : > { %v2231_v50 = vpop.permute.xlu0 %355 }
  0xad   : > { %v2234_v51 = vpop.permute.xlu1 %425 }
  0xae   : > { %662 = vperm.xlu1 %1910, %v2122_v19   ;;  %v494_v19 = vadd.f32 %v421_v44, %v398_v10  ;;  %v402_v44 = vmul.f32 %v2269_v6, %v2205_v37  ;;  %v773_v10 = vld [vmem:[%s2790_s4 + $0x40] sm:$0xff] }
  0xaf   : > { %v416_v52 = vpop.permute.xlu0 %415 }
  0xb0   : > { %v594_v24 = vadd.f32 %v578_v13, %v494_v19  ;;  %v493_v26 = vadd.f32 %v416_v52, %v397_v16 }
  0xb1   : > { %v431_v54 = vpop.permute.xlu1 %430 }
  0xb2   : > { %1912 = vset.pattern.permute.xlu1 %v1975_v3  ;;  %v496_v28 = vadd.f32 %v431_v54, %v400_v23  ;;  %v495_v54 = vadd.f32 %v2234_v51, %v399_v32 }
  0xb3   : > { %490 = vperm.xlu1 %1912, %v312_v53   ;;  %v2245_v55 = vpop.permute.xlu0 %370 }
  0xb6   : > { %v523_v57 = vpop.permute.xlu1 %522 }
  0xb7   : > { %1913 = vset.pattern.permute.xlu1 %v1976_v11  ;;  %v2248_v58 = vpop.permute.xlu0 %465  ;;  %v580_v25 = vmul.f32 %v2271_v8, %v523_v57 }
  0xb8   : > { %570 = vperm.xlu1 %1913, %v2137_v22   ;;  %v678_v22 = vmul.f32 %v2279_v12, %v2197_v34  ;;  %v680_v34 = vmul.f32 %v2279_v12, %v2202_v36  ;;  %v401_v36 = vmul.f32 %v2269_v6, %v2222_v47 }
  0xb9   : > { %v596_v41 = vadd.f32 %v580_v25, %v496_v28  ;;  %v404_v25 = vmul.f32 %v2269_v6, %v2209_v39 }
  0xba   : > { %v694_v35 = vadd.f32 %v678_v22, %v594_v24  ;;  %v778_v24 = vld [vmem:[%s2790_s4 + $0x68] sm:$0xff] }
  0xbb   : > { %v2252_v60 = vpop.permute.xlu1 %618  ;;  %v2254_v61 = vpop.permute.xlu0 %380  ;;  %v696_v0 = vadd.f32 %v680_v34, %v596_v41  ;;  %v780_v41 = vld [vmem:[%s2790_s4 + $0x78] sm:$0xff] }
  0xbc   : > { %1914 = vset.pattern.permute.xlu1 %v1974_v2  ;;  %v710_v63 = vmax.f32 %v694_v35, 0.0  ;;  %v679_v47 = vmul.f32 %v2279_v12, %v2252_v60  ;;  %v776_v60 = vld [vmem:[%s2790_s4 + $0x58] sm:$0xff] }
  0xbd   : > { %666 = vperm.xlu1 %1914, %v2174_v30   ;;  %v772_v30 = vld [vmem:[%s2790_s4 + $0x38] sm:$0xff]  ;;  %v712_v15 = vmax.f32 %v696_v0, 0.0 }
  0xbe   : > { %834 = vperm.xlu0 %1917, %v772_v30   ;;  %v403_v30 = vmul.f32 %v2269_v6, %v2226_v48  ;;  %v779_v48 = vld [vmem:[%s2790_s4 + $0x70] sm:$0xff] }
  0xbf   : > { %v2261_v1 = vpop.permute.xlu0 %475 }
  0xc0   : > { %v2266_v5 = vpop.permute.xlu1 %435 }
  0xc1   : > { %1916 = vset.pattern.permute.xlu1 %v1975_v3  ;;  %v1918_v3 = vld [vmem:[%s2789_s3] sm:$0xff]   ;;  %v497_v13 = vadd.f32 %v2266_v5, %v401_v36  ;;  %v775_v5 = vld [vmem:[%s2790_s4 + $0x50] sm:$0xff] }
  0xc2   : > { %799 = vperm.xlu1 %1916, %v765_v4   ;;  %1792 = vmatprep.mubr.bf16.mxu0 %v1918_v3 }
  0xc3   : > { %v2273_v2 = vpop.permute.xlu0 %390  ;;  %844 = vperm.xlu0 %1917, %v774_v49   ;;  %v784_v49 = vld [vmem:[%s2790_s4 + $0x98] sm:$0xff] }
  0xc4   : > { %v441_v11 = vpop.permute.xlu1 %440 }
  0xc5   : > { %v498_v57 = vadd.f32 %v441_v11, %v402_v44  ;;  %v684_v44 = vmul.f32 %v2279_v12, %v2212_v40 }
  0xc6   : > { %804 = vperm.xlu1 %1916, %v766_v9  }
  0xc7   : > { %v2292_v17 = vpop.permute.xlu0 %485  ;;  %854 = vperm.xlu0 %1917, %v776_v60  }
  0xc9   : > { %v531_v20 = vpop.permute.xlu1 %530 }
  0xca   : > { %814 = vperm.xlu1 %1916, %v768_v18   ;;  %v582_v46 = vmul.f32 %v2271_v8, %v531_v20 }
  0xcb   : > { %864 = vperm.xlu0 %1917, %v778_v24   ;;  %v793_v24 = vld [vmem:[%s2790_s4 + $0xe0] sm:$0xff] }
  0xcc   : > { %v511_v29 = vpop.permute.xlu0 %510  ;;  %v598_v4 = vadd.f32 %v582_v46, %v498_v57 }
  0xcd   : > { %v577_v31 = vmul.f32 %v2271_v8, %v511_v29  ;;  %v777_v29 = vld [vmem:[%s2790_s4 + $0x60] sm:$0xff] }
  0xce   : > { %v627_v43 = vpop.permute.xlu1 %626  ;;  %819 = vperm.xlu1 %1916, %v769_v27   ;;  %v698_v16 = vadd.f32 %v682_v62, %v598_v4  ;;  %v785_v4 = vld [vmem:[%s2790_s4 + $0xa0] sm:$0xff] }
  0xcf   : > { %v593_v52 = vadd.f32 %v577_v31, %v493_v26  ;;  %v681_v18 = vmul.f32 %v2279_v12, %v627_v43  ;;  %874 = vperm.xlu0 %1917, %v780_v41  }
  0xd0   : > { %v519_v53 = vpop.permute.xlu0 %518  ;;  %v714_v26 = vmax.f32 %v698_v16, 0.0 }
  0xd1   : > { %v693_v59 = vadd.f32 %v677_v45, %v593_v52  ;;  %v579_v37 = vmul.f32 %v2271_v8, %v519_v53  ;;  %v782_v53 = vld [vmem:[%s2790_s4 + $0x88] sm:$0xff] }
  0xd2   : > { %829 = vperm.xlu1 %1916, %v771_v33  }
  0xd3   : > { %v709_v7 = vmax.f32 %v693_v59, 0.0  ;;  %v595_v51 = vadd.f32 %v579_v37, %v495_v54  ;;  %v446_v9 = vpop.permute.xlu1 %445  ;;  %v781_v54 = vld [vmem:[%s2790_s4 + $0x80] sm:$0xff]  ;;  %884 = vperm.xlu0 %1917, %v782_v53  }
  0xd4   : > { %v527_v11 = vpop.permute.xlu0 %526  ;;  %v499_v45 = vadd.f32 %v446_v9, %v403_v30  ;;  %v787_v9 = vld [vmem:[%s2790_s4 + $0xb0] sm:$0xff] }
  0xd5   : > { %v757_v3 = vpack.c.bf16 %v710_v63, %v709_v7  ;;  %v695_v38 = vadd.f32 %v679_v47, %v595_v51  ;;  %v581_v14 = vmul.f32 %v2271_v8, %v527_v11  ;;  %v783_v63 = vld [vmem:[%s2790_s4 + $0x90] sm:$0xff]  ;;  %v786_v47 = vld [vmem:[%s2790_s4 + $0xa8] sm:$0xff]  ;;  %v788_v7 = vld [vmem:[%s2790_s4 + $0xb8] sm:$0xff]  ;;  %v405_v11 = vmul.f32 %v2269_v6, %v2231_v50 }
  0xd6   : > { %839 = vperm.xlu1 %1916, %v773_v10   ;;  %v790_v10 = vld [vmem:[%s2790_s4 + $0xc8] sm:$0xff]  ;;  %v791_v50 = vld [vmem:[%s2790_s4 + $0xd0] sm:$0xff] }
  0xd7   : > { %v711_v19 = vmax.f32 %v695_v38, 0.0  ;;  %v597_v20 = vadd.f32 %v581_v14, %v497_v13  ;;  %v451_v21 = vpop.permute.xlu1 %450  ;;  %1776 = vmatprep.subr.bf16.mxu0 %v757_v3  ;;  %1824 = vmatprep.subr.bf16.mxu1 %v757_v3  ;;  %v789_v38 = vld [vmem:[%s2790_s4 + $0xc0] sm:$0xff]  ;;  %v792_v14 = vld [vmem:[%s2790_s4 + $0xd8] sm:$0xff] }
  0xd8   : > { %1777 = vmatpush3.bf16.msra.mxu0 %v757_v3  ;;  %1832 = vmatpush3.bf16.msra.mxu1 %v757_v3  ;;  %v535_v28 = vpop.permute.xlu0 %534  ;;  %v500_v34 = vadd.f32 %v451_v21, %v404_v25  ;;  %v794_v21 = vld [vmem:[%s2790_s4 + $0xe8] sm:$0xff] }
  0xd9   : > { %v758_v22 = vpack.c.bf16 %v712_v15, %v711_v19  ;;  %v697_v23 = vadd.f32 %v681_v18, %v597_v20  ;;  %v583_v39 = vmul.f32 %v2271_v8, %v535_v28  ;;  %894 = vperm.xlu0 %1917, %v784_v49   ;;  %v406_v18 = vmul.f32 %v2269_v6, %v2217_v42 }
  0xda   : > { %849 = vperm.xlu1 %1916, %v775_v5  }
  0xdb   : > { %v713_v27 = vmax.f32 %v697_v23, 0.0  ;;  %1778 = vmatprep.subr.bf16.mxu0 %v758_v22  ;;  %1825 = vmatprep.subr.bf16.mxu1 %v758_v22  ;;  %v599_v52 = vadd.f32 %v583_v39, %v499_v45 }
  0xdc   : > { %v539_v31 = vpop.permute.xlu1 %538  ;;  %1779 = vmatpush3.bf16.msra.mxu0 %v758_v22  ;;  %1833 = vmatpush3.bf16.msra.mxu1 %v758_v22  ;;  %v543_v3 = vpop.permute.xlu0 %542 }
  0xdd   : > { %v759_v32 = vpack.c.bf16 %v714_v26, %v713_v27  ;;  %v584_v35 = vmul.f32 %v2271_v8, %v539_v31  ;;  %904 = vperm.xlu0 %1917, %v786_v47   ;;  %v585_v15 = vmul.f32 %v2271_v8, %v543_v3  ;;  %v796_v27 = vld [vmem:[%s2790_s4 + $0xf8] sm:$0xff] }
  0xde   : > { %859 = vperm.xlu1 %1916, %v777_v29   ;;  %v795_v29 = vld [vmem:[%s2790_s4 + $0xf0] sm:$0xff] }
  0xdf   : > { %v600_v43 = vadd.f32 %v584_v35, %v500_v34  ;;  %1780 = vmatprep.subr.bf16.mxu0 %v759_v32  ;;  %1826 = vmatprep.subr.bf16.mxu1 %v759_v32 }
  0xe0   : > { %1781 = vmatpush3.bf16.msra.mxu0 %v759_v32  ;;  %1834 = vmatpush3.bf16.msra.mxu1 %v759_v32 }
  0xe1   : > { %v635_v46 = vpop.permute.xlu1 %634  ;;  %v700_v33 = vadd.f32 %v684_v44, %v600_v43  ;;  %914 = vperm.xlu0 %1917, %v788_v7   ;;  %v551_v43 = vpop.permute.xlu0 %550 }
  0xe2   : > { %v683_v36 = vmul.f32 %v2279_v12, %v635_v46  ;;  %869 = vperm.xlu1 %1916, %v779_v48   ;;  %v587_v44 = vmul.f32 %v2271_v8, %v551_v43  ;;  %v408_v46 = vmul.f32 %v2269_v6, %v2245_v55  ;;  %v1925_v43 = vld [vmem:[%s2789_s3 + $0x58] sm:$0xff]  }
  0xe3   : > { %v716_v40 = vmax.f32 %v700_v33, 0.0 }
  0xe4   : > { %v699_v57 = vadd.f32 %v683_v36, %v599_v52 }
  0xe5   : > { %924 = vperm.xlu0 %1917, %v790_v10   ;;  %v410_v10 = vmul.f32 %v2269_v6, %v2254_v61  ;;  %v412_v61 = vmul.f32 %v2269_v6, %v2273_v2 }
  0xe6   : > { %v715_v59 = vmax.f32 %v699_v57, 0.0  ;;  %v456_v37 = vpop.permute.xlu1 %455  ;;  %879 = vperm.xlu1 %1916, %v781_v54  }
  0xe7   : > { %v501_v60 = vadd.f32 %v456_v37, %v405_v11 }
  0xe8   : > { %v760_v62 = vpack.c.bf16 %v716_v40, %v715_v59 }
  0xe9   : > { %934 = vperm.xlu0 %1917, %v792_v14   ;;  %v601_v5 = vadd.f32 %v585_v15, %v501_v60 }
  0xea   : > { %v461_v0 = vpop.permute.xlu1 %460  ;;  %1782 = vmatprep.subr.bf16.mxu0 %v760_v62  ;;  %1827 = vmatprep.subr.bf16.mxu1 %v760_v62 }
  0xeb   : > { %1783 = vmatpush3.bf16.msra.mxu0 %v760_v62  ;;  %1835 = vmatpush3.bf16.msra.mxu1 %v760_v62  ;;  %v502_v22 = vadd.f32 %v461_v0, %v406_v18 }
  0xec   : > { %889 = vperm.xlu1 %1916, %v783_v63  }
  0xed   : > { %944 = vperm.xlu0 %1917, %v794_v21  }
  0xef   : > { %v547_v51 = vpop.permute.xlu1 %546 }
  0xf0   : > { %899 = vperm.xlu1 %1916, %v785_v4   ;;  %v586_v19 = vmul.f32 %v2271_v8, %v547_v51  ;;  %v559_v4 = vpop.permute.xlu0 %558 }
  0xf1   : > { %954 = vperm.xlu0 %1917, %v796_v27   ;;  %v589_v51 = vmul.f32 %v2271_v8, %v559_v4 }
  0xf2   : > { %v602_v25 = vadd.f32 %v586_v19, %v502_v22 }
  0xf4   : > { %v366_v13 = vpop.permute.xlu1 %365  ;;  %909 = vperm.xlu1 %1916, %v787_v9   ;;  %v567_v18 = vpop.permute.xlu0 %566 }
  0xf5   : > { %v407_v39 = vmul.f32 %v2269_v6, %v366_v13 }
  0xf7   : > { %v503_v48 = vadd.f32 %v2248_v58, %v407_v39  ;;  %v1921_v39 = vld [vmem:[%s2789_s3 + $0x48] sm:$0xff]  }
  0xf8   : > { %919 = vperm.xlu1 %1916, %v789_v38   ;;  %v671_v22 = vpop.permute.xlu0 %670 }
  0xf9   : > { %v643_v16 = vpop.permute.xlu1 %642  ;;  %v603_v36 = vadd.f32 %v587_v44, %v503_v48  ;;  %v1926_v48 = vld [vmem:[%s2789_s3 + $0x20] sm:$0xff]  }
  0xfa   : > { %v685_v20 = vmul.f32 %v2279_v12, %v643_v16  ;;  %v1927_v44 = vld [vmem:[%s2789_s3 + $0x60] sm:$0xff]  }
  0xfc   : > { %929 = vperm.xlu1 %1916, %v791_v50   ;;  %v701_v26 = vadd.f32 %v685_v20, %v601_v5 }
  0xfd   : > { %v647_v23 = vpop.permute.xlu1 %646 }
  0xfe   : > { %v686_v42 = vmul.f32 %v2279_v12, %v647_v23  ;;  %v717_v30 = vmax.f32 %v701_v26, 0.0 }
 0x100   : > { %v702_v28 = vadd.f32 %v686_v42, %v602_v25  ;;  %939 = vperm.xlu1 %1916, %v793_v24   ;;  %v692_v42 = vmul.f32 %v2279_v12, %v671_v22 }
 0x102   : > { %v718_v31 = vmax.f32 %v702_v28, 0.0  ;;  %v471_v32 = vpop.permute.xlu1 %470  ;;  %v591_v28 = vmul.f32 %v2271_v8, %v567_v18 }
 0x103   : > { %v504_v53 = vadd.f32 %v471_v32, %v408_v46  ;;  %v1929_v46 = vld [vmem:[%s2789_s3 + $0x68] sm:$0xff]  }
 0x104   : > { %v761_v34 = vpack.c.bf16 %v718_v31, %v717_v30  ;;  %949 = vperm.xlu1 %1916, %v795_v29  }
 0x106   : > { %1784 = vmatprep.subr.bf16.mxu0 %v761_v34  ;;  %1828 = vmatprep.subr.bf16.mxu1 %v761_v34 }
 0x107   : > { %v555_v35 = vpop.permute.xlu1 %554  ;;  %1785 = vmatpush3.bf16.msra.mxu0 %v761_v34  ;;  %1836 = vmatpush3.bf16.msra.mxu1 %v761_v34 }
 0x108   : > { %v588_v52 = vmul.f32 %v2271_v8, %v555_v35 }
 0x10a   : > { %v604_v57 = vadd.f32 %v588_v52, %v504_v53  ;;  %v1930_v52 = vld [vmem:[%s2789_s3 + $0x30] sm:$0xff]   ;;  %v1933_v53 = vld [vmem:[%s2789_s3 + $0x78] sm:$0xff]  }
 0x10c   : > { %v376_v41 = vpop.permute.xlu1 %375 }
 0x10d   : > { %v409_v55 = vmul.f32 %v2269_v6, %v376_v41  ;;  %v1924_v41 = vld [vmem:[%s2789_s3 + $0x18] sm:$0xff]  }
 0x10f   : > { %v505_v7 = vadd.f32 %v2261_v1, %v409_v55 }
 0x111   : > { %v651_v45 = vpop.permute.xlu1 %650  ;;  %v605_v3 = vadd.f32 %v589_v51, %v505_v7 }
 0x112   : > { %v687_v33 = vmul.f32 %v2279_v12, %v651_v45  ;;  %v1928_v45 = vld [vmem:[%s2789_s3 + $0x28] sm:$0xff]  }
 0x114   : > { %v703_v40 = vadd.f32 %v687_v33, %v603_v36  ;;  %v1931_v33 = vld [vmem:[%s2789_s3 + $0x70] sm:$0xff]   ;;  %v1932_v36 = vld [vmem:[%s2789_s3 + $0x38] sm:$0xff]  }
 0x115   : > { %v655_v54 = vpop.permute.xlu1 %654 }
 0x116   : > { %v688_v59 = vmul.f32 %v2279_v12, %v655_v54  ;;  %v719_v49 = vmax.f32 %v703_v40, 0.0 }
 0x118   : > { %v704_v37 = vadd.f32 %v688_v59, %v604_v57  ;;  %v810_v59 = vpop.permute.xlu0 %809 }
 0x11a   : > { %v720_v58 = vmax.f32 %v704_v37, 0.0  ;;  %v481_v62 = vpop.permute.xlu1 %480 }
 0x11b   : > { %v506_v38 = vadd.f32 %v481_v62, %v410_v10 }
 0x11c   : > { %v762_v63 = vpack.c.bf16 %v720_v58, %v719_v49  ;;  %v825_v49 = vpop.permute.xlu0 %824 }
 0x11e   : > { %1786 = vmatprep.subr.bf16.mxu0 %v762_v63  ;;  %1829 = vmatprep.subr.bf16.mxu1 %v762_v63 }
 0x11f   : > { %v563_v0 = vpop.permute.xlu1 %562  ;;  %1787 = vmatpush3.bf16.msra.mxu0 %v762_v63  ;;  %1837 = vmatpush3.bf16.msra.mxu1 %v762_v63 }
 0x120   : > { %v590_v11 = vmul.f32 %v2271_v8, %v563_v0 }
 0x122   : > { %v606_v15 = vadd.f32 %v590_v11, %v506_v38 }
 0x124   : > { %v386_v47 = vpop.permute.xlu1 %385 }
 0x125   : > { %v411_v5 = vmul.f32 %v2269_v6, %v386_v47 }
 0x127   : > { %v507_v26 = vadd.f32 %v2292_v17, %v411_v5  ;;  %v1920_v17 = vld [vmem:[%s2789_s3 + $0x8] sm:$0xff]  }
 0x129   : > { %v659_v9 = vpop.permute.xlu1 %658  ;;  %v607_v31 = vadd.f32 %v591_v28, %v507_v26 }
 0x12a   : > { %v689_v13 = vmul.f32 %v2279_v12, %v659_v9 }
 0x12c   : > { %v705_v60 = vadd.f32 %v689_v13, %v605_v3 }
 0x12d   : > { %v663_v14 = vpop.permute.xlu1 %662 }
 0x12e   : > { %v690_v16 = vmul.f32 %v2279_v12, %v663_v14  ;;  %v721_v1 = vmax.f32 %v705_v60, 0.0 }
 0x130   : > { %v706_v50 = vadd.f32 %v690_v16, %v606_v15 }
 0x132   : > { %v722_v19 = vmax.f32 %v706_v50, 0.0  ;;  %v491_v20 = vpop.permute.xlu1 %490 }
 0x133   : > { %v508_v24 = vadd.f32 %v491_v20, %v412_v61 }
 0x134   : > { %v763_v21 = vpack.c.bf16 %v722_v19, %v721_v1 }
 0x136   : > { %1788 = vmatprep.subr.bf16.mxu0 %v763_v21  ;;  %1830 = vmatprep.subr.bf16.mxu1 %v763_v21 }
 0x137   : > { %v571_v23 = vpop.permute.xlu1 %570  ;;  %1789 = vmatpush3.bf16.msra.mxu0 %v763_v21  ;;  %1838 = vmatpush3.bf16.msra.mxu1 %v763_v21 }
 0x138   : > { %v592_v25 = vmul.f32 %v2271_v8, %v571_v23  ;;  %v1922_v8 = vld [vmem:[%s2789_s3 + $0x10] sm:$0xff]  }
 0x13a   : > { %v608_v27 = vadd.f32 %v592_v25, %v508_v24 }
 0x13c   : > { %v667_v29 = vpop.permute.xlu1 %666  ;;  %v708_v30 = vadd.f32 %v692_v42, %v608_v27 }
 0x13d   : > { %v691_v6 = vmul.f32 %v2279_v12, %v667_v29  ;;  %v1923_v12 = vld [vmem:[%s2789_s3 + $0x50] sm:$0xff]   ;;  %v835_v62 = vpop.permute.xlu0 %834 }
 0x13e   : > { %v724_v32 = vmax.f32 %v708_v30, 0.0 }
 0x13f   : > { %v707_v2 = vadd.f32 %v691_v6, %v607_v31 }
 0x141   : > { %v723_v34 = vmax.f32 %v707_v2, 0.0  ;;  %v800_v54 = vpop.permute.xlu1 %799 }
 0x142   : > { %v2490_v0 = vpop.permute.xlu0 %844 }
 0x143   : > { %v764_v35 = vpack.c.bf16 %v724_v32, %v723_v34 }
 0x145   : > { %1790 = vmatprep.subr.bf16.mxu0 %v764_v35  ;;  %1831 = vmatprep.subr.bf16.mxu1 %v764_v35  ;;  %v805_v57 = vpop.permute.xlu1 %804 }
 0x146   : > { %1791 = vmatpush3.bf16.msra.mxu0 %v764_v35  ;;  %1839 = vmatpush3.bf16.msra.mxu1 %v764_v35  ;;  %v855_v47 = vpop.permute.xlu0 %854 }
 0x149   : > { %1793 = vmatmul.mubr.bf16.vlgmr.msra.gmra.mrb[0].mxu0 %v1920_v17  ;;  %1809 = vmatmul.mubr.bf16.vlgmr.msra.gmra.mrb[0].mxu1 %v1921_v39  ;;  %v815_v40 = vpop.permute.xlu1 %814 }
 0x14a   : > { %1796 = vmatprep.mubr.bf16.mxu0 %v1922_v8  ;;  %1812 = vmatprep.mubr.bf16.mxu1 %v1923_v12  ;;  %v2494_v7 = vpop.permute.xlu0 %864 }
 0x14d   : > { %v820_v37 = vpop.permute.xlu1 %819 }
 0x14e   : > { %v2498_v9 = vpop.permute.xlu0 %874 }
 0x151   : > { %1797 = vmatmul.mubr.bf16.gmra.mrb[4].mxu0 %v1924_v41  ;;  %1813 = vmatmul.mubr.bf16.gmra.mrb[4].mxu1 %v1925_v43  ;;  %v830_v58 = vpop.permute.xlu1 %829 }
 0x152   : > { %1800 = vmatprep.mubr.bf16.mxu0 %v1926_v48  ;;  %1816 = vmatprep.mubr.bf16.mxu1 %v1927_v44  ;;  %v885_v11 = vpop.permute.xlu0 %884 }
 0x155   : > { %v840_v63 = vpop.permute.xlu1 %839 }
 0x158   : > { %v895_v3 = vpop.permute.xlu0 %894 }
 0x159   : > { %1801 = vmatmul.mubr.bf16.gmra.mrb[8].mxu0 %v1928_v45  ;;  %1817 = vmatmul.mubr.bf16.gmra.mrb[8].mxu1 %v1929_v46  ;;  %v850_v55 = vpop.permute.xlu1 %849 }
 0x15a   : > { %1804 = vmatprep.mubr.bf16.mxu0 %v1930_v52  ;;  %1820 = vmatprep.mubr.bf16.mxu1 %v1931_v33 }
 0x15c   : > { %v905_v14 = vpop.permute.xlu0 %904 }
 0x15d   : > { %v2492_v4 = vpop.permute.xlu1 %859 }
 0x160   : > { %v915_v60 = vpop.permute.xlu0 %914 }
 0x161   : > { %1805 = vmatmul.mubr.bf16.gmra.mrb[12].mxu0 %v1932_v36  ;;  %1821 = vmatmul.mubr.bf16.gmra.mrb[12].mxu1 %v1933_v53  ;;  %v2496_v51 = vpop.permute.xlu1 %869 }
 0x164   : > { %v925_v50 = vpop.permute.xlu0 %924 }
 0x165   : > { %v880_v10 = vpop.permute.xlu1 %879 }
 0x168   : > { %v935_v31 = vpop.permute.xlu0 %934 }
 0x16b   : > { %v890_v13 = vpop.permute.xlu1 %889 }
 0x16c   : > { %v945_v36 = vpop.permute.xlu0 %944 }
 0x16f   : > { %v900_v38 = vpop.permute.xlu1 %899 }
 0x173   : > { %v910_v15 = vpop.permute.xlu1 %909 }
 0x177   : > { %v920_v16 = vpop.permute.xlu1 %919 }
 0x17b   : > { %v930_v30 = vpop.permute.xlu1 %929 }
 0x17f   : > { %v940_v33 = vpop.permute.xlu1 %939 }
 0x21c   : > { %v1794_v18 = vpop.f32.mrb[0].mxu0  ;;  %v1810_v1 = vpop.f32.mrb[0].mxu1 }
 0x21d   : > { %v2500_v19 = vadd.f32 %v1794_v18, %v810_v59  ;;  %v2502_v20 = vadd.f32 %v1810_v1, %v890_v13  ;;  %v1087_v21 = vpop.f32.mrb[1].mxu0  ;;  %v1151_v5 = vpop.f32.mrb[1].mxu1 }
 0x21e   : > { %v2504_v61 = vadd.f32 %v1087_v21, %v800_v54  ;;  %v2506_v22 = vadd.f32 %v1151_v5, %v880_v10  ;;  %v1795_v23 = vpop.f32.mrb[2].mxu0  ;;  %v1811_v24 = vpop.f32.mrb[2].mxu1 }
 0x21f   : > { %v2508_v25 = vadd.f32 %v1795_v23, %v815_v40  ;;  %v2510_v26 = vadd.f32 %v1811_v24, %v895_v3  ;;  %v1090_v42 = vpop.f32.mrb[3].mxu0  ;;  %v1154_v27 = vpop.f32.mrb[3].mxu1 }
 0x220   : > { %v2512_v28 = vadd.f32 %v1090_v42, %v805_v57  ;;  %v2514_v29 = vadd.f32 %v1154_v27, %v885_v11 }
 0x224   : > { %v1798_v6 = vpop.f32.mrb[4].mxu0  ;;  %v1814_v2 = vpop.f32.mrb[4].mxu1 }
 0x225   : > { %v2516_v32 = vadd.f32 %v1798_v6, %v830_v58  ;;  %v2518_v34 = vadd.f32 %v1814_v2, %v910_v15  ;;  %v1103_v35 = vpop.f32.mrb[5].mxu0  ;;  %v1167_v17 = vpop.f32.mrb[5].mxu1 }
 0x226   : > { %v2520_v39 = vadd.f32 %v1103_v35, %v820_v37  ;;  %v2522_v8 = vadd.f32 %v1167_v17, %v900_v38  ;;  %v1799_v12 = vpop.f32.mrb[6].mxu0  ;;  %v1815_v41 = vpop.f32.mrb[6].mxu1 }
 0x227   : > { %v2524_v43 = vadd.f32 %v1799_v12, %v835_v62  ;;  %v2526_v48 = vadd.f32 %v1815_v41, %v915_v60  ;;  %v1106_v44 = vpop.f32.mrb[7].mxu0  ;;  %v1170_v45 = vpop.f32.mrb[7].mxu1 }
 0x228   : > { %v2528_v46 = vadd.f32 %v1106_v44, %v825_v49  ;;  %v2530_v52 = vadd.f32 %v1170_v45, %v905_v14  ;;  %v950_v15 = vpop.permute.xlu1 %949  ;;  %v955_v60 = vpop.permute.xlu0 %954 }
 0x22c   : > { %v1802_v53 = vpop.f32.mrb[8].mxu0  ;;  %v1818_v54 = vpop.f32.mrb[8].mxu1 }
 0x22d   : > { %v2532_v57 = vadd.f32 %v1802_v53, %v850_v55  ;;  %v2534_v40 = vadd.f32 %v1818_v54, %v930_v30  ;;  %v1119_v59 = vpop.f32.mrb[9].mxu0  ;;  %v1183_v37 = vpop.f32.mrb[9].mxu1 }
 0x22e   : > { %v2536_v58 = vadd.f32 %v1119_v59, %v840_v63  ;;  %v2538_v62 = vadd.f32 %v1183_v37, %v920_v16  ;;  %v1803_v10 = vpop.f32.mrb[10].mxu0  ;;  %v1819_v11 = vpop.f32.mrb[10].mxu1 }
 0x22f   : > { %v2540_v49 = vadd.f32 %v1803_v10, %v855_v47  ;;  %v2542_v13 = vadd.f32 %v1819_v11, %v935_v31  ;;  %v1122_v3 = vpop.f32.mrb[11].mxu0  ;;  %v1186_v38 = vpop.f32.mrb[11].mxu1 }
 0x230   : > { %v2545_v14 = vadd.f32 %v1122_v3, %v2490_v0  ;;  %v2547_v55 = vadd.f32 %v1186_v38, %v925_v50 }
 0x232   : > { %1217 = sbr.rel (%p1744_p7) target bundleno = 583 (0x247), region = 44 }
 0x234   : > { %v1806_v18 = vpop.f32.mrb[12].mxu0  ;;  %v1822_v63 = vpop.f32.mrb[12].mxu1 }
 0x235   : > { %v2550_v16 = vadd.f32 %v1806_v18, %v2496_v51  ;;  %v2552_v1 = vadd.f32 %v1822_v63, %v950_v15  ;;  %v1135_v47 = vpop.f32.mrb[13].mxu0  ;;  %v1199_v21 = vpop.f32.mrb[13].mxu1 }
 0x236   : > { %v2555_v5 = vadd.f32 %v1135_v47, %v2492_v4  ;;  %v2557_v23 = vadd.f32 %v1199_v21, %v940_v33  ;;  %v1807_v0 = vpop.f32.mrb[14].mxu0  ;;  %v1823_v24 = vpop.f32.mrb[14].mxu1  ;;  %v1977_v4 = vmov (!%p1744_p7), -inf  }
 0x237   : > { %v2560_v50 = vadd.f32 %v1807_v0, %v2498_v9  ;;  %v2562_v42 = vadd.f32 %v1823_v24, %v955_v60  ;;  %v1138_v27 = vpop.f32.mrb[15].mxu0  ;;  %v1202_v30 = vpop.f32.mrb[15].mxu1  ;;  %1218 = vst [vmem:[#allocation2] sm:$0xff] (!%p1744_p7), %v1977_v4  ;;  %1219 = vst [vmem:[#allocation2 + $0x8] sm:$0xff] (!%p1744_p7), %v1977_v4 }
 0x238   : > { %v2565_v51 = vadd.f32 %v1138_v27, %v2494_v7  ;;  %v2567_v31 = vadd.f32 %v1202_v30, %v945_v36  ;;  %1220 = vst [vmem:[#allocation2 + $0x10] sm:$0xff] (!%p1744_p7), %v1977_v4  ;;  %1221 = vst [vmem:[#allocation2 + $0x18] sm:$0xff] (!%p1744_p7), %v1977_v4 }
 0x239   : > { %1222 = vst [vmem:[#allocation2 + $0x20] sm:$0xff] %v1977_v4  ;;  %1223 = vst [vmem:[#allocation2 + $0x28] sm:$0xff] %v1977_v4 }
 0x23a   : > { %1224 = vst [vmem:[#allocation2 + $0x30] sm:$0xff] %v1977_v4  ;;  %1225 = vst [vmem:[#allocation2 + $0x38] sm:$0xff] %v1977_v4 }
 0x23b   : > { %1226 = vst [vmem:[#allocation2 + $0x40] sm:$0xff] %v1977_v4  ;;  %1227 = vst [vmem:[#allocation2 + $0x48] sm:$0xff] %v1977_v4 }
 0x23c   : > { %1228 = vst [vmem:[#allocation2 + $0x50] sm:$0xff] %v1977_v4  ;;  %1229 = vst [vmem:[#allocation2 + $0x58] sm:$0xff] %v1977_v4 }
 0x23d   : > { %1230 = vst [vmem:[#allocation2 + $0x60] sm:$0xff] %v1977_v4  ;;  %1231 = vst [vmem:[#allocation2 + $0x68] sm:$0xff] %v1977_v4 }
 0x23e   : > { %1232 = vst [vmem:[#allocation2 + $0x70] sm:$0xff] %v1977_v4  ;;  %1233 = vst [vmem:[#allocation2 + $0x78] sm:$0xff] %v1977_v4 }
 0x23f   : > { %1234 = vst [vmem:[#allocation2 + $0x80] sm:$0xff] %v1977_v4  ;;  %1235 = vst [vmem:[#allocation2 + $0x88] sm:$0xff] %v1977_v4 }
 0x240   : > { %1236 = vst [vmem:[#allocation2 + $0x90] sm:$0xff] %v1977_v4  ;;  %1237 = vst [vmem:[#allocation2 + $0x98] sm:$0xff] %v1977_v4 }
 0x241   : > { %1238 = vst [vmem:[#allocation2 + $0xa0] sm:$0xff] %v1977_v4  ;;  %1239 = vst [vmem:[#allocation2 + $0xa8] sm:$0xff] %v1977_v4 }
 0x242   : > { %1240 = vst [vmem:[#allocation2 + $0xb0] sm:$0xff] %v1977_v4  ;;  %1241 = vst [vmem:[#allocation2 + $0xb8] sm:$0xff] %v1977_v4 }
 0x243   : > { %1242 = vst [vmem:[#allocation2 + $0xc0] sm:$0xff] %v1977_v4  ;;  %1243 = vst [vmem:[#allocation2 + $0xc8] sm:$0xff] %v1977_v4 }
 0x244   : > { %1244 = vst [vmem:[#allocation2 + $0xd0] sm:$0xff] %v1977_v4  ;;  %1245 = vst [vmem:[#allocation2 + $0xd8] sm:$0xff] %v1977_v4 }
 0x245   : > { %1246 = vst [vmem:[#allocation2 + $0xe0] sm:$0xff] %v1977_v4  ;;  %1247 = vst [vmem:[#allocation2 + $0xe8] sm:$0xff] %v1977_v4 }
 0x246   : > { %1248 = vst [vmem:[#allocation2 + $0xf0] sm:$0xff] %v1977_v4  ;;  %1249 = vst [vmem:[#allocation2 + $0xf8] sm:$0xff] %v1977_v4 }
 0x247 PF: > { %1255 = sbr.rel (%p262_p6) target bundleno = 607 (0x25f), region = 48  ;;  %v1257_v7 = vand.u32 (!%p262_p6), 127, %v393_v56  ;;  %s1746_s12 = sshll.u32 (!%p262_p6), %s1956_s18, 7  ;;  %v1268_v53 = vld [vmem:[#allocation2 + $0x30] sm:$0xff] (!%p262_p6)  ;;  %v1269_v54 = vld [vmem:[#allocation2 + $0x38] sm:$0xff] (!%p262_p6)  ;;  %v1270_v3 = vld [vmem:[#allocation2 + $0x40] sm:$0xff] (!%p262_p6) }
 0x248   : > { %v1259_v9 = vstv (!%p262_p6), %s1746_s12  ;;  %v1271_v38 = vld [vmem:[#allocation2 + $0x48] sm:$0xff] (!%p262_p6)  ;;  %v1272_v47 = vld [vmem:[#allocation2 + $0x50] sm:$0xff] (!%p262_p6)  ;;  %v1273_v21 = vld [vmem:[#allocation2 + $0x58] sm:$0xff] (!%p262_p6) }
 0x249   : > { %v2574_v6 = vadd.s32 (!%p262_p6), %v1259_v9, %v1257_v7  ;;  %v1274_v4 = vld [vmem:[#allocation2 + $0x60] sm:$0xff] (!%p262_p6)  ;;  %v1275_v7 = vld [vmem:[#allocation2 + $0x68] sm:$0xff] (!%p262_p6) }
 0x24b   : > { %vm1261_vm0 = vcmp.lt.s32.totalorder (!%p262_p6), %v2574_v6, 300 }
 0x24c   : > { %v1262_v2 = vld [vmem:[#allocation2] sm:$0xff] (!%p262_p6)  ;;  %v1263_v35 = vld [vmem:[#allocation2 + $0x8] sm:$0xff] (!%p262_p6)  ;;  %v1296_v45 = vsel (!%p262_p6), %vm1261_vm0, %v2504_v61, -inf  ;;  %v1297_v56 = vsel (!%p262_p6), %vm1261_vm0, %v2512_v28, -inf  ;;  %v1298_v33 = vsel (!%p262_p6), %vm1261_vm0, %v2500_v19, -inf  ;;  %v1299_v36 = vsel (!%p262_p6), %vm1261_vm0, %v2508_v25, -inf }
 0x24d   : > { %v1264_v17 = vld [vmem:[#allocation2 + $0x10] sm:$0xff] (!%p262_p6)  ;;  %v1265_v12 = vld [vmem:[#allocation2 + $0x18] sm:$0xff] (!%p262_p6)  ;;  %v1328_v59 = vmax.f32 (!%p262_p6), %v1262_v2, %v1296_v45  ;;  %v1329_v37 = vmax.f32 (!%p262_p6), %v1263_v35, %v1297_v56  ;;  %v1300_v15 = vsel (!%p262_p6), %vm1261_vm0, %v2520_v39, -inf  ;;  %v1301_v60 = vsel (!%p262_p6), %vm1261_vm0, %v2528_v46, -inf }
 0x24e   : > { %v1266_v41 = vld [vmem:[#allocation2 + $0x20] sm:$0xff]  ;;  %v1267_v44 = vld [vmem:[#allocation2 + $0x28] sm:$0xff]  ;;  %v1330_v10 = vmax.f32 %v1264_v17, %v1298_v33  ;;  %v1331_v11 = vmax.f32 %v1265_v12, %v1299_v36  ;;  %v1302_v18 = vsel %vm1261_vm0, %v2516_v32, -inf  ;;  %v1303_v63 = vsel %vm1261_vm0, %v2524_v43, -inf  ;;  %v1276_v12 = vld [vmem:[#allocation2 + $0x70] sm:$0xff] }
 0x24f   : > { %1360 = vst [vmem:[#allocation2] sm:$0xff] %v1328_v59  ;;  %1361 = vst [vmem:[#allocation2 + $0x8] sm:$0xff] %v1329_v37  ;;  %v1332_v0 = vmax.f32 %v1266_v41, %v1300_v15  ;;  %v1333_v24 = vmax.f32 %v1267_v44, %v1301_v60  ;;  %v1334_v27 = vmax.f32 %v1268_v53, %v1302_v18  ;;  %v1304_v9 = vsel %vm1261_vm0, %v2536_v58, -inf  ;;  %v1277_v41 = vld [vmem:[#allocation2 + $0x78] sm:$0xff]  ;;  %v1278_v36 = vld [vmem:[#allocation2 + $0x80] sm:$0xff] }
 0x250   : > { %1362 = vst [vmem:[#allocation2 + $0x10] sm:$0xff] %v1330_v10  ;;  %1363 = vst [vmem:[#allocation2 + $0x18] sm:$0xff] %v1331_v11  ;;  %v1335_v30 = vmax.f32 %v1269_v54, %v1303_v63  ;;  %v1305_v2 = vsel %vm1261_vm0, %v2545_v14, -inf  ;;  %v1306_v35 = vsel %vm1261_vm0, %v2532_v57, -inf  ;;  %v1307_v17 = vsel %vm1261_vm0, %v2540_v49, -inf  ;;  %v1279_v53 = vld [vmem:[#allocation2 + $0x88] sm:$0xff] }
 0x251   : > { %1364 = vst [vmem:[#allocation2 + $0x20] sm:$0xff] %v1332_v0  ;;  %1365 = vst [vmem:[#allocation2 + $0x28] sm:$0xff] %v1333_v24  ;;  %v1336_v44 = vmax.f32 %v1270_v3, %v1304_v9  ;;  %v1337_v45 = vmax.f32 %v1271_v38, %v1305_v2  ;;  %v1338_v56 = vmax.f32 %v1272_v47, %v1306_v35  ;;  %v1308_v54 = vsel %vm1261_vm0, %v2555_v5, -inf  ;;  %v1280_v11 = vld [vmem:[#allocation2 + $0x90] sm:$0xff]  ;;  %v1281_v3 = vld [vmem:[#allocation2 + $0x98] sm:$0xff] }
 0x252   : > { %1366 = vst [vmem:[#allocation2 + $0x30] sm:$0xff] %v1334_v27  ;;  %1367 = vst [vmem:[#allocation2 + $0x38] sm:$0xff] %v1335_v30  ;;  %v1339_v33 = vmax.f32 %v1273_v21, %v1307_v17  ;;  %v1309_v59 = vsel %vm1261_vm0, %v2565_v51, -inf  ;;  %v1310_v37 = vsel %vm1261_vm0, %v2550_v16, -inf  ;;  %v1311_v10 = vsel %vm1261_vm0, %v2560_v50, -inf  ;;  %v1282_v63 = vld [vmem:[#allocation2 + $0xa0] sm:$0xff] }
 0x253   : > { %1368 = vst [vmem:[#allocation2 + $0x40] sm:$0xff] %v1336_v44  ;;  %1369 = vst [vmem:[#allocation2 + $0x48] sm:$0xff] %v1337_v45  ;;  %v1340_v38 = vmax.f32 %v1274_v4, %v1308_v54  ;;  %v1341_v15 = vmax.f32 %v1275_v7, %v1309_v59  ;;  %v1342_v60 = vmax.f32 %v1276_v12, %v1310_v37  ;;  %v1283_v47 = vld [vmem:[#allocation2 + $0xa8] sm:$0xff]  ;;  %v1312_v21 = vsel %vm1261_vm0, %v2506_v22, -inf  ;;  %v1284_v30 = vld [vmem:[#allocation2 + $0xb0] sm:$0xff] }
 0x254   : > { %1370 = vst [vmem:[#allocation2 + $0x50] sm:$0xff] %v1338_v56  ;;  %1371 = vst [vmem:[#allocation2 + $0x58] sm:$0xff] %v1339_v33  ;;  %v1343_v18 = vmax.f32 %v1277_v41, %v1311_v10  ;;  %v1313_v0 = vsel %vm1261_vm0, %v2514_v29, -inf  ;;  %v1314_v24 = vsel %vm1261_vm0, %v2502_v20, -inf  ;;  %v1315_v27 = vsel %vm1261_vm0, %v2510_v26, -inf  ;;  %v1285_v4 = vld [vmem:[#allocation2 + $0xb8] sm:$0xff] }
 0x255   : > { %1372 = vst [vmem:[#allocation2 + $0x60] sm:$0xff] %v1340_v38  ;;  %1373 = vst [vmem:[#allocation2 + $0x68] sm:$0xff] %v1341_v15  ;;  %v1344_v7 = vmax.f32 %v1278_v36, %v1312_v21  ;;  %v1345_v9 = vmax.f32 %v1279_v53, %v1313_v0  ;;  %v1346_v2 = vmax.f32 %v1280_v11, %v1314_v24  ;;  %v1286_v17 = vld [vmem:[#allocation2 + $0xc0] sm:$0xff]  ;;  %v1287_v12 = vld [vmem:[#allocation2 + $0xc8] sm:$0xff]  ;;  %v1316_v41 = vsel %vm1261_vm0, %v2522_v8, -inf }
 0x256   : > { %1374 = vst [vmem:[#allocation2 + $0x70] sm:$0xff] %v1342_v60  ;;  %1375 = vst [vmem:[#allocation2 + $0x78] sm:$0xff] %v1343_v18  ;;  %v1347_v35 = vmax.f32 %v1281_v3, %v1315_v27  ;;  %v1317_v44 = vsel %vm1261_vm0, %v2530_v52, -inf  ;;  %v1318_v45 = vsel %vm1261_vm0, %v2518_v34, -inf  ;;  %v1319_v56 = vsel %vm1261_vm0, %v2526_v48, -inf  ;;  %v1288_v33 = vld [vmem:[#allocation2 + $0xd0] sm:$0xff] }
 0x257   : > { %v1289_v36 = vld [vmem:[#allocation2 + $0xd8] sm:$0xff]  ;;  %1376 = vst [vmem:[#allocation2 + $0x80] sm:$0xff] %v1344_v7  ;;  %1377 = vst [vmem:[#allocation2 + $0x88] sm:$0xff] %v1345_v9  ;;  %v1348_v53 = vmax.f32 %v1282_v63, %v1316_v41  ;;  %v1349_v54 = vmax.f32 %v1283_v47, %v1317_v44  ;;  %v1350_v59 = vmax.f32 %v1284_v30, %v1318_v45  ;;  %v1290_v10 = vld [vmem:[#allocation2 + $0xe0] sm:$0xff]  ;;  %v1320_v3 = vsel %vm1261_vm0, %v2538_v62, -inf }
 0x258   : > { %1378 = vst [vmem:[#allocation2 + $0x90] sm:$0xff] %v1346_v2  ;;  %1379 = vst [vmem:[#allocation2 + $0x98] sm:$0xff] %v1347_v35  ;;  %v1351_v37 = vmax.f32 %v1285_v4, %v1319_v56  ;;  %v1291_v11 = vld [vmem:[#allocation2 + $0xe8] sm:$0xff]  ;;  %v1321_v38 = vsel %vm1261_vm0, %v2547_v55, -inf  ;;  %v1322_v15 = vsel %vm1261_vm0, %v2534_v40, -inf  ;;  %v1323_v60 = vsel %vm1261_vm0, %v2542_v13, -inf }
 0x259   : > { %v1292_v18 = vld [vmem:[#allocation2 + $0xf0] sm:$0xff]  ;;  %v1293_v63 = vld [vmem:[#allocation2 + $0xf8] sm:$0xff]  ;;  %1380 = vst [vmem:[#allocation2 + $0xa0] sm:$0xff] %v1348_v53  ;;  %1381 = vst [vmem:[#allocation2 + $0xa8] sm:$0xff] %v1349_v54  ;;  %v1352_v47 = vmax.f32 %v1286_v17, %v1320_v3  ;;  %v1353_v21 = vmax.f32 %v1287_v12, %v1321_v38  ;;  %v1354_v0 = vmax.f32 %v1288_v33, %v1322_v15  ;;  %v1324_v27 = vsel %vm1261_vm0, %v2557_v23, -inf }
 0x25a   : > { %1382 = vst [vmem:[#allocation2 + $0xb0] sm:$0xff] %v1350_v59  ;;  %1383 = vst [vmem:[#allocation2 + $0xb8] sm:$0xff] %v1351_v37  ;;  %v1355_v24 = vmax.f32 %v1289_v36, %v1323_v60  ;;  %v1325_v30 = vsel %vm1261_vm0, %v2567_v31, -inf  ;;  %v1326_v4 = vsel %vm1261_vm0, %v2552_v1, -inf  ;;  %v1327_v7 = vsel %vm1261_vm0, %v2562_v42, -inf }
 0x25b   : > { %1384 = vst [vmem:[#allocation2 + $0xc0] sm:$0xff] %v1352_v47  ;;  %1385 = vst [vmem:[#allocation2 + $0xc8] sm:$0xff] %v1353_v21  ;;  %v1356_v9 = vmax.f32 %v1290_v10, %v1324_v27  ;;  %v1357_v2 = vmax.f32 %v1291_v11, %v1325_v30  ;;  %v1358_v35 = vmax.f32 %v1292_v18, %v1326_v4 }
 0x25c   : > { %1386 = vst [vmem:[#allocation2 + $0xd0] sm:$0xff] %v1354_v0  ;;  %1387 = vst [vmem:[#allocation2 + $0xd8] sm:$0xff] %v1355_v24  ;;  %v1359_v17 = vmax.f32 %v1293_v63, %v1327_v7 }
 0x25d   : > { %1388 = vst [vmem:[#allocation2 + $0xe0] sm:$0xff] %v1356_v9  ;;  %1389 = vst [vmem:[#allocation2 + $0xe8] sm:$0xff] %v1357_v2 }
 0x25e   : > { %1390 = vst [vmem:[#allocation2 + $0xf0] sm:$0xff] %v1358_v35  ;;  %1391 = vst [vmem:[#allocation2 + $0xf8] sm:$0xff] %v1359_v17 }
 0x25f PF: > { %p1747_p8 = scmp.ge.s32.totalorder %s1956_s18, 2 }
 0x260   : > { %v1396_v12 = vld [vmem:[#allocation2] sm:$0xff] (!%p1747_p8)  ;;  %v1397_v41 = vld [vmem:[#allocation2 + $0x8] sm:$0xff] (!%p1747_p8)  ;;  %v1398_v6 = vld [vmem:[#allocation2 + $0x10] sm:$0xff] (!%p1747_p8) }
 0x261   : > { %1395 = sbr.rel (%p1747_p8) target bundleno = 627 (0x273), region = 52  ;;  %v1428_v44 = vmax.f32 (!%p1747_p8), %v1396_v12, %v2504_v61  ;;  %v1429_v45 = vmax.f32 (!%p1747_p8), %v1397_v41, %v2512_v28  ;;  %v1430_v56 = vmax.f32 (!%p1747_p8), %v1398_v6, %v2500_v19  ;;  %v1399_v33 = vld [vmem:[#allocation2 + $0x18] sm:$0xff] (!%p1747_p8)  ;;  %v1400_v36 = vld [vmem:[#allocation2 + $0x20] sm:$0xff] (!%p1747_p8)  ;;  %v1401_v53 = vld [vmem:[#allocation2 + $0x28] sm:$0xff] (!%p1747_p8) }
 0x262   : > { %v1431_v54 = vmax.f32 (!%p1747_p8), %v1399_v33, %v2508_v25  ;;  %v1432_v59 = vmax.f32 (!%p1747_p8), %v1400_v36, %v2520_v39  ;;  %v1433_v37 = vmax.f32 (!%p1747_p8), %v1401_v53, %v2528_v46  ;;  %v1402_v10 = vld [vmem:[#allocation2 + $0x30] sm:$0xff] (!%p1747_p8)  ;;  %v1403_v11 = vld [vmem:[#allocation2 + $0x38] sm:$0xff] (!%p1747_p8)  ;;  %v1404_v3 = vld [vmem:[#allocation2 + $0x40] sm:$0xff] (!%p1747_p8) }
 0x263   : > { %1460 = vst [vmem:[#allocation2] sm:$0xff] (!%p1747_p8), %v1428_v44  ;;  %1461 = vst [vmem:[#allocation2 + $0x8] sm:$0xff] (!%p1747_p8), %v1429_v45  ;;  %v1434_v61 = vmax.f32 (!%p1747_p8), %v1402_v10, %v2516_v32  ;;  %v1435_v28 = vmax.f32 (!%p1747_p8), %v1403_v11, %v2524_v43  ;;  %v1436_v19 = vmax.f32 (!%p1747_p8), %v1404_v3, %v2536_v58  ;;  %v1405_v38 = vld [vmem:[#allocation2 + $0x48] sm:$0xff] (!%p1747_p8)  ;;  %v1406_v15 = vld [vmem:[#allocation2 + $0x50] sm:$0xff] (!%p1747_p8) }
 0x264   : > { %1462 = vst [vmem:[#allocation2 + $0x10] sm:$0xff] (!%p1747_p8), %v1430_v56  ;;  %v1407_v60 = vld [vmem:[#allocation2 + $0x58] sm:$0xff] (!%p1747_p8)  ;;  %1463 = vst [vmem:[#allocation2 + $0x18] sm:$0xff] (!%p1747_p8), %v1431_v54  ;;  %v1437_v25 = vmax.f32 (!%p1747_p8), %v1405_v38, %v2545_v14  ;;  %v1438_v39 = vmax.f32 (!%p1747_p8), %v1406_v15, %v2532_v57  ;;  %v1408_v18 = vld [vmem:[#allocation2 + $0x60] sm:$0xff] (!%p1747_p8) }
 0x265   : > { %1464 = vst [vmem:[#allocation2 + $0x20] sm:$0xff] (!%p1747_p8), %v1432_v59  ;;  %1465 = vst [vmem:[#allocation2 + $0x28] sm:$0xff] (!%p1747_p8), %v1433_v37  ;;  %v1439_v46 = vmax.f32 (!%p1747_p8), %v1407_v60, %v2540_v49  ;;  %v1409_v63 = vld [vmem:[#allocation2 + $0x68] sm:$0xff] (!%p1747_p8)  ;;  %v1410_v47 = vld [vmem:[#allocation2 + $0x70] sm:$0xff] (!%p1747_p8)  ;;  %v1440_v32 = vmax.f32 (!%p1747_p8), %v1408_v18, %v2555_v5 }
 0x266   : > { %1466 = vst [vmem:[#allocation2 + $0x30] sm:$0xff] (!%p1747_p8), %v1434_v61  ;;  %1467 = vst [vmem:[#allocation2 + $0x38] sm:$0xff] (!%p1747_p8), %v1435_v28  ;;  %v1441_v43 = vmax.f32 (!%p1747_p8), %v1409_v63, %v2565_v51  ;;  %v1442_v58 = vmax.f32 (!%p1747_p8), %v1410_v47, %v2550_v16  ;;  %v1411_v21 = vld [vmem:[#allocation2 + $0x78] sm:$0xff] (!%p1747_p8)  ;;  %v1412_v0 = vld [vmem:[#allocation2 + $0x80] sm:$0xff] (!%p1747_p8) }
 0x267   : > { %1468 = vst [vmem:[#allocation2 + $0x40] sm:$0xff] (!%p1747_p8), %v1436_v19  ;;  %v1413_v24 = vld [vmem:[#allocation2 + $0x88] sm:$0xff] (!%p1747_p8)  ;;  %1469 = vst [vmem:[#allocation2 + $0x48] sm:$0xff] (!%p1747_p8), %v1437_v25  ;;  %v1443_v57 = vmax.f32 (!%p1747_p8), %v1411_v21, %v2560_v50  ;;  %v1444_v49 = vmax.f32 (!%p1747_p8), %v1412_v0, %v2506_v22  ;;  %v1414_v27 = vld [vmem:[#allocation2 + $0x90] sm:$0xff] (!%p1747_p8) }
 0x268   : > { %1470 = vst [vmem:[#allocation2 + $0x50] sm:$0xff] %v1438_v39  ;;  %1471 = vst [vmem:[#allocation2 + $0x58] sm:$0xff] %v1439_v46  ;;  %v1445_v14 = vmax.f32 %v1413_v24, %v2514_v29  ;;  %v1415_v30 = vld [vmem:[#allocation2 + $0x98] sm:$0xff]  ;;  %v1416_v4 = vld [vmem:[#allocation2 + $0xa0] sm:$0xff]  ;;  %v1446_v16 = vmax.f32 %v1414_v27, %v2502_v20 }
 0x269   : > { %1472 = vst [vmem:[#allocation2 + $0x60] sm:$0xff] %v1440_v32  ;;  %1473 = vst [vmem:[#allocation2 + $0x68] sm:$0xff] %v1441_v43  ;;  %v1447_v5 = vmax.f32 %v1415_v30, %v2510_v26  ;;  %v1448_v51 = vmax.f32 %v1416_v4, %v2522_v8  ;;  %v1417_v7 = vld [vmem:[#allocation2 + $0xa8] sm:$0xff]  ;;  %v1418_v9 = vld [vmem:[#allocation2 + $0xb0] sm:$0xff] }
 0x26a   : > { %1474 = vst [vmem:[#allocation2 + $0x70] sm:$0xff] %v1442_v58  ;;  %v1419_v2 = vld [vmem:[#allocation2 + $0xb8] sm:$0xff]  ;;  %1475 = vst [vmem:[#allocation2 + $0x78] sm:$0xff] %v1443_v57  ;;  %v1449_v22 = vmax.f32 %v1417_v7, %v2530_v52  ;;  %v1450_v29 = vmax.f32 %v1418_v9, %v2518_v34  ;;  %v1420_v35 = vld [vmem:[#allocation2 + $0xc0] sm:$0xff] }
 0x26b   : > { %1476 = vst [vmem:[#allocation2 + $0x80] sm:$0xff] %v1444_v49  ;;  %1477 = vst [vmem:[#allocation2 + $0x88] sm:$0xff] %v1445_v14  ;;  %v1451_v50 = vmax.f32 %v1419_v2, %v2526_v48  ;;  %v1421_v17 = vld [vmem:[#allocation2 + $0xc8] sm:$0xff]  ;;  %v1422_v12 = vld [vmem:[#allocation2 + $0xd0] sm:$0xff]  ;;  %v1452_v20 = vmax.f32 %v1420_v35, %v2538_v62 }
 0x26c   : > { %1478 = vst [vmem:[#allocation2 + $0x90] sm:$0xff] %v1446_v16  ;;  %1479 = vst [vmem:[#allocation2 + $0x98] sm:$0xff] %v1447_v5  ;;  %v1453_v26 = vmax.f32 %v1421_v17, %v2547_v55  ;;  %v1454_v8 = vmax.f32 %v1422_v12, %v2534_v40  ;;  %v1423_v41 = vld [vmem:[#allocation2 + $0xd8] sm:$0xff]  ;;  %v1424_v6 = vld [vmem:[#allocation2 + $0xe0] sm:$0xff] }
 0x26d   : > { %1480 = vst [vmem:[#allocation2 + $0xa0] sm:$0xff] %v1448_v51  ;;  %v1425_v44 = vld [vmem:[#allocation2 + $0xe8] sm:$0xff]  ;;  %1481 = vst [vmem:[#allocation2 + $0xa8] sm:$0xff] %v1449_v22  ;;  %v1455_v34 = vmax.f32 %v1423_v41, %v2542_v13  ;;  %v1456_v48 = vmax.f32 %v1424_v6, %v2557_v23  ;;  %v1426_v45 = vld [vmem:[#allocation2 + $0xf0] sm:$0xff] }
 0x26e   : > { %1482 = vst [vmem:[#allocation2 + $0xb0] sm:$0xff] %v1450_v29  ;;  %1483 = vst [vmem:[#allocation2 + $0xb8] sm:$0xff] %v1451_v50  ;;  %v1457_v52 = vmax.f32 %v1425_v44, %v2567_v31  ;;  %v1427_v56 = vld [vmem:[#allocation2 + $0xf8] sm:$0xff]  ;;  %v1458_v62 = vmax.f32 %v1426_v45, %v2552_v1 }
 0x26f   : > { %1484 = vst [vmem:[#allocation2 + $0xc0] sm:$0xff] %v1452_v20  ;;  %1485 = vst [vmem:[#allocation2 + $0xc8] sm:$0xff] %v1453_v26  ;;  %v1459_v40 = vmax.f32 %v1427_v56, %v2562_v42 }
 0x270   : > { %1486 = vst [vmem:[#allocation2 + $0xd0] sm:$0xff] %v1454_v8  ;;  %1487 = vst [vmem:[#allocation2 + $0xd8] sm:$0xff] %v1455_v34 }
 0x271   : > { %1488 = vst [vmem:[#allocation2 + $0xe0] sm:$0xff] %v1456_v48  ;;  %1489 = vst [vmem:[#allocation2 + $0xe8] sm:$0xff] %v1457_v52 }
 0x272   : > { %1490 = vst [vmem:[#allocation2 + $0xf0] sm:$0xff] %v1458_v62  ;;  %1491 = vst [vmem:[#allocation2 + $0xf8] sm:$0xff] %v1459_v40 }
 0x273 PF: > { %p1748_p9 = scmp.ne.s32.totalorder %s1956_s18, 2 }
 0x274   : > { %v1509_v10 = vld [vmem:[#allocation2 + $0x68] sm:$0xff] (!%p1748_p9)  ;;  %v1508_v11 = vld [vmem:[#allocation2 + $0x60] sm:$0xff] (!%p1748_p9)  ;;  %v1511_v3 = vld [vmem:[#allocation2 + $0x78] sm:$0xff] (!%p1748_p9)  ;;  %vm1592_vm1 = vcmask (!%p1748_p9), 7168  }
 0x275   : > { %1495 = sbr.rel (%p1748_p9) target bundleno = 834 (0x342), region = 56  ;;  %v1496_v55 = vld [vmem:[#allocation2] sm:$0xff] (!%p1748_p9)  ;;  %v1497_v31 = vld [vmem:[#allocation2 + $0x8] sm:$0xff] (!%p1748_p9)  ;;  %v1510_v61 = vld [vmem:[#allocation2 + $0x70] sm:$0xff] (!%p1748_p9) }
 0x276   : > { %v1498_v13 = vld [vmem:[#allocation2 + $0x10] sm:$0xff] (!%p1748_p9)  ;;  %1528 = vmax.xlane.f32.xlu0 (!%p1748_p9), %v1496_v55  ;;  %v1499_v23 = vld [vmem:[#allocation2 + $0x18] sm:$0xff] (!%p1748_p9)  ;;  %v1513_v28 = vld [vmem:[#allocation2 + $0x88] sm:$0xff] (!%p1748_p9) }
 0x277   : > { %1532 = vmax.xlane.f32.xlu1 (!%p1748_p9), %v1498_v13  ;;  %v1501_v1 = vld [vmem:[#allocation2 + $0x28] sm:$0xff] (!%p1748_p9)  ;;  %v1500_v33 = vld [vmem:[#allocation2 + $0x20] sm:$0xff] (!%p1748_p9)  ;;  %v1515_v38 = vld [vmem:[#allocation2 + $0x98] sm:$0xff] (!%p1748_p9) }
 0x278   : > { %v1503_v42 = vld [vmem:[#allocation2 + $0x38] sm:$0xff] (!%p1748_p9)  ;;  %v1502_v36 = vld [vmem:[#allocation2 + $0x30] sm:$0xff] (!%p1748_p9)  ;;  %v1512_v19 = vld [vmem:[#allocation2 + $0x80] sm:$0xff] (!%p1748_p9) }
 0x279   : > { %v1505_v53 = vld [vmem:[#allocation2 + $0x48] sm:$0xff] (!%p1748_p9)  ;;  %v1504_v54 = vld [vmem:[#allocation2 + $0x40] sm:$0xff] (!%p1748_p9)  ;;  %v1514_v15 = vld [vmem:[#allocation2 + $0x90] sm:$0xff] (!%p1748_p9) }
 0x27a   : > { %1530 = vmax.xlane.f32.xlu0 (!%p1748_p9), %v1497_v31  ;;  %v1507_v59 = vld [vmem:[#allocation2 + $0x58] sm:$0xff] (!%p1748_p9)  ;;  %v1506_v37 = vld [vmem:[#allocation2 + $0x50] sm:$0xff] (!%p1748_p9)  ;;  %v1517_v60 = vld [vmem:[#allocation2 + $0xa8] sm:$0xff] (!%p1748_p9) }
 0x27b   : > { %1534 = vmax.xlane.f32.xlu1 (!%p1748_p9), %v1499_v23  ;;  %v1516_v25 = vld [vmem:[#allocation2 + $0xa0] sm:$0xff] (!%p1748_p9)  ;;  %v1519_v39 = vld [vmem:[#allocation2 + $0xb8] sm:$0xff] (!%p1748_p9)  ;;  %v1518_v46 = vld [vmem:[#allocation2 + $0xb0] sm:$0xff] (!%p1748_p9) }
 0x27c   : > { %v1521_v18 = vld [vmem:[#allocation2 + $0xc8] sm:$0xff]  ;;  %v1520_v63 = vld [vmem:[#allocation2 + $0xc0] sm:$0xff]  ;;  %v1523_v47 = vld [vmem:[#allocation2 + $0xd8] sm:$0xff] }
 0x27d   : > { %v1522_v32 = vld [vmem:[#allocation2 + $0xd0] sm:$0xff]  ;;  %v1525_v43 = vld [vmem:[#allocation2 + $0xe8] sm:$0xff]  ;;  %v1524_v58 = vld [vmem:[#allocation2 + $0xe0] sm:$0xff] }
 0x27e   : > { %1536 = vmax.xlane.f32.xlu0 %v1500_v33  ;;  %v1527_v21 = vld [vmem:[#allocation2 + $0xf8] sm:$0xff]  ;;  %v1526_v0 = vld [vmem:[#allocation2 + $0xf0] sm:$0xff] }
 0x27f   : > { %1538 = vmax.xlane.f32.xlu1 %v1501_v1 }
 0x282   : > { %1540 = vmax.xlane.f32.xlu0 %v1502_v36 }
 0x283   : > { %1542 = vmax.xlane.f32.xlu1 %v1503_v42 }
 0x286   : > { %1544 = vmax.xlane.f32.xlu0 %v1504_v54 }
 0x287   : > { %1546 = vmax.xlane.f32.xlu1 %v1505_v53 }
 0x28a   : > { %1548 = vmax.xlane.f32.xlu0 %v1506_v37 }
 0x28b   : > { %1550 = vmax.xlane.f32.xlu1 %v1507_v59 }
 0x28e   : > { %1552 = vmax.xlane.f32.xlu0 %v1508_v11 }
 0x28f   : > { %1554 = vmax.xlane.f32.xlu1 %v1509_v10 }
 0x292   : > { %1556 = vmax.xlane.f32.xlu0 %v1510_v61 }
 0x293   : > { %1558 = vmax.xlane.f32.xlu1 %v1511_v3 }
 0x296   : > { %1560 = vmax.xlane.f32.xlu0 %v1512_v19 }
 0x297   : > { %1562 = vmax.xlane.f32.xlu1 %v1513_v28 }
 0x29a   : > { %1564 = vmax.xlane.f32.xlu0 %v1514_v15 }
 0x29b   : > { %1566 = vmax.xlane.f32.xlu1 %v1515_v38 }
 0x29e   : > { %1568 = vmax.xlane.f32.xlu0 %v1516_v25 }
 0x29f   : > { %1570 = vmax.xlane.f32.xlu1 %v1517_v60 }
 0x2a2   : > { %1572 = vmax.xlane.f32.xlu0 %v1518_v46 }
 0x2a3   : > { %1574 = vmax.xlane.f32.xlu1 %v1519_v39 }
 0x2a6   : > { %1576 = vmax.xlane.f32.xlu0 %v1520_v63 }
 0x2a7   : > { %1578 = vmax.xlane.f32.xlu1 %v1521_v18 }
 0x2aa   : > { %1580 = vmax.xlane.f32.xlu0 %v1522_v32 }
 0x2ab   : > { %1582 = vmax.xlane.f32.xlu1 %v1523_v47 }
 0x2ae   : > { %1584 = vmax.xlane.f32.xlu0 %v1524_v58 }
 0x2af   : > { %1586 = vmax.xlane.f32.xlu1 %v1525_v43 }
 0x2b2   : > { %1588 = vmax.xlane.f32.xlu0 %v1526_v0 }
 0x2b3   : > { %1590 = vmax.xlane.f32.xlu1 %v1527_v21 }
 0x303   : > { %v1529_v57 = vpop.xlane.xlu0 %1528 }
 0x304   : > { %v1533_v24 = vpop.xlane.xlu1 %1532  ;;  %1593 = vst.msk [vmem:[%s2060_s9] sm:$0xff] %vm1592_vm1, %v1529_v57 }
 0x305   : > { %1595 = vst.msk [vmem:[%s2060_s9 + $0x10] sm:$0xff] %vm1592_vm1, %v1533_v24 }
 0x307   : > { %v1531_v14 = vpop.xlane.xlu0 %1530 }
 0x308   : > { %v1535_v49 = vpop.xlane.xlu1 %1534  ;;  %1594 = vst.msk [vmem:[%s2060_s9 + $0x8] sm:$0xff] %vm1592_vm1, %v1531_v14 }
 0x309   : > { %1596 = vst.msk [vmem:[%s2060_s9 + $0x18] sm:$0xff] %vm1592_vm1, %v1535_v49 }
 0x30b   : > { %v1537_v30 = vpop.xlane.xlu0 %1536 }
 0x30c   : > { %v1539_v27 = vpop.xlane.xlu1 %1538  ;;  %1597 = vst.msk [vmem:[%s2060_s9 + $0x20] sm:$0xff] %vm1592_vm1, %v1537_v30 }
 0x30d   : > { %1598 = vst.msk [vmem:[%s2060_s9 + $0x28] sm:$0xff] %vm1592_vm1, %v1539_v27 }
 0x30f   : > { %v1541_v16 = vpop.xlane.xlu0 %1540 }
 0x310   : > { %v1543_v4 = vpop.xlane.xlu1 %1542  ;;  %1599 = vst.msk [vmem:[%s2060_s9 + $0x30] sm:$0xff] %vm1592_vm1, %v1541_v16 }
 0x311   : > { %1600 = vst.msk [vmem:[%s2060_s9 + $0x38] sm:$0xff] %vm1592_vm1, %v1543_v4 }
 0x313   : > { %v1545_v51 = vpop.xlane.xlu0 %1544 }
 0x314   : > { %v1547_v5 = vpop.xlane.xlu1 %1546  ;;  %1601 = vst.msk [vmem:[%s2060_s9 + $0x40] sm:$0xff] %vm1592_vm1, %v1545_v51 }
 0x315   : > { %1602 = vst.msk [vmem:[%s2060_s9 + $0x48] sm:$0xff] %vm1592_vm1, %v1547_v5 }
 0x317   : > { %v1549_v9 = vpop.xlane.xlu0 %1548 }
 0x318   : > { %v1551_v7 = vpop.xlane.xlu1 %1550  ;;  %1603 = vst.msk [vmem:[%s2060_s9 + $0x50] sm:$0xff] %vm1592_vm1, %v1549_v9 }
 0x319   : > { %1604 = vst.msk [vmem:[%s2060_s9 + $0x58] sm:$0xff] %vm1592_vm1, %v1551_v7 }
 0x31b   : > { %v1553_v22 = vpop.xlane.xlu0 %1552 }
 0x31c   : > { %v1555_v2 = vpop.xlane.xlu1 %1554  ;;  %1605 = vst.msk [vmem:[%s2060_s9 + $0x60] sm:$0xff] %vm1592_vm1, %v1553_v22 }
 0x31d   : > { %1606 = vst.msk [vmem:[%s2060_s9 + $0x68] sm:$0xff] %vm1592_vm1, %v1555_v2 }
 0x31f   : > { %v1557_v50 = vpop.xlane.xlu0 %1556 }
 0x320   : > { %v1559_v29 = vpop.xlane.xlu1 %1558  ;;  %1607 = vst.msk [vmem:[%s2060_s9 + $0x70] sm:$0xff] %vm1592_vm1, %v1557_v50 }
 0x321   : > { %1608 = vst.msk [vmem:[%s2060_s9 + $0x78] sm:$0xff] %vm1592_vm1, %v1559_v29 }
 0x323   : > { %v1561_v17 = vpop.xlane.xlu0 %1560 }
 0x324   : > { %v1563_v35 = vpop.xlane.xlu1 %1562  ;;  %1609 = vst.msk [vmem:[%s2060_s9 + $0x80] sm:$0xff] %vm1592_vm1, %v1561_v17 }
 0x325   : > { %1610 = vst.msk [vmem:[%s2060_s9 + $0x88] sm:$0xff] %vm1592_vm1, %v1563_v35 }
 0x327   : > { %v1565_v20 = vpop.xlane.xlu0 %1564 }
 0x328   : > { %v1567_v12 = vpop.xlane.xlu1 %1566  ;;  %1611 = vst.msk [vmem:[%s2060_s9 + $0x90] sm:$0xff] %vm1592_vm1, %v1565_v20 }
 0x329   : > { %1612 = vst.msk [vmem:[%s2060_s9 + $0x98] sm:$0xff] %vm1592_vm1, %v1567_v12 }
 0x32b   : > { %v1569_v8 = vpop.xlane.xlu0 %1568 }
 0x32c   : > { %v1571_v26 = vpop.xlane.xlu1 %1570  ;;  %1613 = vst.msk [vmem:[%s2060_s9 + $0xa0] sm:$0xff] %vm1592_vm1, %v1569_v8 }
 0x32d   : > { %1614 = vst.msk [vmem:[%s2060_s9 + $0xa8] sm:$0xff] %vm1592_vm1, %v1571_v26 }
 0x32f   : > { %v1573_v6 = vpop.xlane.xlu0 %1572 }
 0x330   : > { %v1575_v41 = vpop.xlane.xlu1 %1574  ;;  %1615 = vst.msk [vmem:[%s2060_s9 + $0xb0] sm:$0xff] %vm1592_vm1, %v1573_v6 }
 0x331   : > { %1616 = vst.msk [vmem:[%s2060_s9 + $0xb8] sm:$0xff] %vm1592_vm1, %v1575_v41 }
 0x333   : > { %v1577_v34 = vpop.xlane.xlu0 %1576 }
 0x334   : > { %v1579_v44 = vpop.xlane.xlu1 %1578  ;;  %1617 = vst.msk [vmem:[%s2060_s9 + $0xc0] sm:$0xff] %vm1592_vm1, %v1577_v34 }
 0x335   : > { %1618 = vst.msk [vmem:[%s2060_s9 + $0xc8] sm:$0xff] %vm1592_vm1, %v1579_v44 }
 0x337   : > { %v1581_v52 = vpop.xlane.xlu0 %1580 }
 0x338   : > { %v1583_v48 = vpop.xlane.xlu1 %1582  ;;  %1619 = vst.msk [vmem:[%s2060_s9 + $0xd0] sm:$0xff] %vm1592_vm1, %v1581_v52 }
 0x339   : > { %1620 = vst.msk [vmem:[%s2060_s9 + $0xd8] sm:$0xff] %vm1592_vm1, %v1583_v48 }
 0x33b   : > { %v1585_v56 = vpop.xlane.xlu0 %1584 }
 0x33c   : > { %v1587_v45 = vpop.xlane.xlu1 %1586  ;;  %1621 = vst.msk [vmem:[%s2060_s9 + $0xe0] sm:$0xff] %vm1592_vm1, %v1585_v56 }
 0x33d   : > { %1622 = vst.msk [vmem:[%s2060_s9 + $0xe8] sm:$0xff] %vm1592_vm1, %v1587_v45 }
 0x33f   : > { %v1589_v40 = vpop.xlane.xlu0 %1588 }
 0x340   : > { %v1591_v62 = vpop.xlane.xlu1 %1590  ;;  %1623 = vst.msk [vmem:[%s2060_s9 + $0xf0] sm:$0xff] %vm1592_vm1, %v1589_v40 }
 0x341   : > { %1624 = vst.msk [vmem:[%s2060_s9 + $0xf8] sm:$0xff] %vm1592_vm1, %v1591_v62 }
 0x342 PF: > { %s15_s22 = sadd.s32 1, %s1972_s22   ;;  %s2792_s18 = smov %s1964_s20 }
 0x343   : > { %p12_p10 = scmp.ge.s32.totalorder %s15_s22, 8   ;;  %s2793_s19 = smov %s1968_s21 }
 0x344   : > { %s2794_s20 = smov %s2797_s23  ;;  %s2795_s21 = smov %s2801_s24 }
 0x345   :  { %14 = sbr.rel (!%p12_p10) target bundleno = 3 (0x3), region = 86 }

</bundles_post_ra>
